<compile_context>
chip_gen: v7x
topology: tpu7x:2x2x1
jax: 0.10.0
libtpu: 0.0.40
codegen_flags: <defaults>
</compile_context>

<pallas_src>
import math

import jax
import jax.numpy as jnp
from jax.experimental import pallas as pl
from jax.experimental.pallas import tpu as pltpu

BN_EPS = 1e-5
NUM_STAGES = 4
POOL_RATIO = 0.5


def _pool_schedule(n_nodes):
    """Active-node count entering each stage (and after the last pooling)."""
    counts = [int(n_nodes)]
    for _ in range(NUM_STAGES):
        counts.append(int(math.ceil(POOL_RATIO * counts[-1])))
    return counts


def _make_fused_kernel(counts, n_pad, h_pad):
    """Single fused forward for one graph (all shapes / counts static)."""
    neg_big = -1e30 / float(h_pad)          # per-lane value summing to ~-1e30
    nt_dims = (((1,), (1,)), ((), ()))      # contract last dims (NT matmul)

    def kernel(a_ref, x_ref, wf_ref, aff_ref, ws_ref, out_ref):
        f32 = jnp.float32
        a = a_ref[0]                                          # (NP,NP)
        x = x_ref[0]                                          # (NP,HP)

        # Constants (hoisted out of the stage loop).
        sub_ids = jax.lax.broadcasted_iota(jnp.int32, (n_pad, n_pad), 0)   # i
        lane_ids = jax.lax.broadcasted_iota(jnp.int32, (n_pad, n_pad), 1)  # j
        ones_nh = jnp.ones((n_pad, h_pad), f32)
        node_idx = jax.lax.broadcasted_iota(jnp.int32, (n_pad, h_pad), 0)

        # Lane-replicated keep-mask: every masking op stays pure VPU and the
        # degree matvec becomes a standard (NP,NP)x(NP,HP) matmul.
        mask = (node_idx < counts[0]).astype(f32)             # (NP,HP)

        for i in range(NUM_STAGES):
            n_act = counts[i]          # nodes entering this stage (static)
            k_keep = counts[i + 1]     # nodes kept by SAGPooling   (static)

            aff = aff_ref[i]                                  # (8,HP)
            b_fused = aff[0:1, :]
            gamma = aff[1:2, :]
            beta = aff[2:3, :]
            ws = ws_ref[i]                                    # (8,HP)
            w_rel = ws[0:1, :]
            w_root = ws[1:2, :]
            b_rel = ws[2:3, 0:1]                              # (1,1)

            # ---- gcn_norm degrees of the (cumulatively) filtered graph ----
            deg = jnp.dot(a, mask, preferred_element_type=f32)[:, 0:1] + 1.0
            dinv = jax.lax.rsqrt(deg)                         # (NP,1)

            # ---- fused GCNConv+Linear:  relu(A_hat @ (x@W_fused) + b) ----
            xw = jnp.dot(x, wf_ref[i], preferred_element_type=f32)
            nbr = jnp.dot(a, xw * dinv, preferred_element_type=f32)
            z = jnp.maximum(dinv * nbr + xw * (dinv * dinv) + b_fused, 0.0)

            # ---- BatchNorm1d: training-mode stats over ACTIVE nodes,
            #      two-pass variance ----
            inv_n = 1.0 / float(n_act)
            mean = jnp.sum(z * mask, axis=0, keepdims=True) * inv_n
            zc = (z - mean) * mask
            var = jnp.sum(zc * zc, axis=0, keepdims=True) * inv_n
            z = (z - mean) * jax.lax.rsqrt(var + BN_EPS) * gamma + beta

            # ---- SAGPooling score: GraphConv(H,1), sum aggregation over
            #      kept neighbours ----
            agg = jnp.dot(a, z * mask, preferred_element_type=f32)
            contrib = agg * w_rel + z * w_root                # (NP,HP)
            contrib_m = jnp.where(mask > 0.0, contrib, neg_big)
            # Scores broadcast along lanes (s_j) and along sublanes (s_i) via
            # identically-shaped NT matmuls -> exact ties stay exactly equal.
            s_lane = jax.lax.dot_general(ones_nh, contrib_m, nt_dims,
                                         preferred_element_type=f32)
            s_sub = jax.lax.dot_general(contrib_m, ones_nh, nt_dims,
                                        preferred_element_type=f32)

            # ---- top-k (static k): rank_i = #{j beats i}, lower index wins
            #      on ties; dead nodes carry -1e30 and never beat live ones.
            beats = ((s_lane > s_sub) |
                     ((s_lane == s_sub) & (lane_ids < sub_ids))).astype(f32)
            rank = jnp.sum(beats, axis=-1, keepdims=True)     # (NP,1)
            mask = ((rank < float(k_keep)) & (mask > 0.0)).astype(f32)

            # ---- x <- x[kept] * tanh(score[kept]) (filter_adj is implicit) ----
            s_col = s_sub[:, 0:1] + b_rel                     # (NP,1)
            x = z * jnp.tanh(s_col) * mask

        # ---- global_mean_pool over the finally kept nodes of this graph ----
        pooled = jnp.sum(x, axis=0, keepdims=True) * (1.0 / float(counts[-1]))
        out_ref[0] = jnp.broadcast_to(pooled, (8, h_pad))     # unmasked store

    return kernel


def gcn_forward(x, a, params, hidden):
    """Fused forward for a batch of independent graphs.

    x: (G, N, F) node features, a: (G, N, N) dense adjacency (no self loops).
    Returns (G, hidden): one global_mean_pool row per graph.
    """
    n_graphs, n_nodes, n_feat = x.shape
    h_pad = params["w_fused"].shape[-1]
    n_pad = max(8, ((n_nodes + 7) // 8) * 8)      # sublane-aligned node count
    counts = _pool_schedule(n_nodes)

    x_pad = jnp.zeros((n_graphs, n_pad, h_pad), jnp.float32)
    x_pad = x_pad.at[:, :n_nodes, :n_feat].set(x.astype(jnp.float32))
    a_pad = jnp.zeros((n_graphs, n_pad, n_pad), jnp.float32)
    a_pad = a_pad.at[:, :n_nodes, :n_nodes].set(a.astype(jnp.float32))

    grid_spec = pltpu.PrefetchScalarGridSpec(
        num_scalar_prefetch=0,
        grid=(n_graphs,),
        in_specs=[
            pl.BlockSpec((1, n_pad, n_pad), lambda g: (g, 0, 0)),     # A
            pl.BlockSpec((1, n_pad, h_pad), lambda g: (g, 0, 0)),     # x
            pl.BlockSpec((NUM_STAGES, h_pad, h_pad), lambda g: (0, 0, 0)),
            pl.BlockSpec((NUM_STAGES, 8, h_pad), lambda g: (0, 0, 0)),
            pl.BlockSpec((NUM_STAGES, 8, h_pad), lambda g: (0, 0, 0)),
        ],
        out_specs=pl.BlockSpec((1, 8, h_pad), lambda g: (g, 0, 0)),
    )
    out = pl.pallas_call(
        _make_fused_kernel(counts, n_pad, h_pad),
        grid_spec=grid_spec,
        out_shape=jax.ShapeDtypeStruct((n_graphs, 8, h_pad), jnp.float32),
        compiler_params=pltpu.CompilerParams(
            dimension_semantics=("parallel",)),
    )(a_pad, x_pad, params["w_fused"], params["aff"], params["w_score"])
    return out[:, 0, :hidden]


def init_params(key, class_num, hidden, h_pad=None):
    """Synthetic parameters with the per-stage Linear folded into GCNConv:
         W_fused = Wconv @ Wfc,   b_fused = b_conv @ Wfc + b_fc.
    Packed, lane-dense layouts:
      w_fused: (4, HP, HP)
      aff:     (4, 8, HP)   rows: [b_fused, gamma, beta, 0...]
      w_score: (4, 8, HP)   rows: [w_rel, w_root, b_rel@lane0, 0...]
    """
    if h_pad is None:
        h_pad = ((max(hidden, class_num) + 127) // 128) * 128

    w_fused = jnp.zeros((NUM_STAGES, h_pad, h_pad), jnp.float32)
    aff = jnp.zeros((NUM_STAGES, 8, h_pad), jnp.float32)
    w_score = jnp.zeros((NUM_STAGES, 8, h_pad), jnp.float32)

    cin = class_num
    for s in range(NUM_STAGES):
        key, k0, k1, k2, k3, k4, k5, k6 = jax.random.split(key, 8)
        w_conv = (jax.random.normal(k0, (cin, hidden)) * 0.1).astype(jnp.float32)
        b_conv = (jax.random.normal(k6, (hidden,)) * 0.1).astype(jnp.float32)
        w_fc = (jax.random.normal(k1, (hidden, hidden)) * 0.1).astype(jnp.float32)
        b_fc = (jax.random.normal(k2, (hidden,)) * 0.1).astype(jnp.float32)

        wf = w_conv @ w_fc                     # (cin, hidden)   host-side fold
        bf = b_conv @ w_fc + b_fc              # (hidden,)

        w_fused = w_fused.at[s, :cin, :hidden].set(wf)
        aff = aff.at[s, 0, :hidden].set(bf)
        aff = aff.at[s, 1, :hidden].set(1.0)   # gamma ; beta row stays zero
        w_score = w_score.at[s, 0, :hidden].set(
            (jax.random.normal(k3, (hidden,)) * 0.1).astype(jnp.float32))
        w_score = w_score.at[s, 1, :hidden].set(
            (jax.random.normal(k4, (hidden,)) * 0.1).astype(jnp.float32))
        w_score = w_score.at[s, 2, 0].set(
            (jax.random.normal(k5, ()) * 0.1).astype(jnp.float32))
        cin = hidden
    return dict(w_fused=w_fused, aff=aff, w_score=w_score)


if __name__ == "__main__":
    G, N, CLASS_NUM, HIDDEN = 2, 16, 7, 128    # hidden matches the module default
    key = jax.random.PRNGKey(0)
    kx, ke, kp = jax.random.split(key, 3)

    # node features per graph
    x = jax.random.normal(kx, (G, N, CLASS_NUM), jnp.float32)

    # random undirected edge_index per graph -> dense adjacency (no self loops)
    ei = jax.random.randint(ke, (G, 2, 40), 0, N)
    a = jnp.zeros((G, N, N), jnp.float32)
    for g in range(G):
        ag = jnp.zeros((N, N), jnp.float32).at[ei[g, 0], ei[g, 1]].set(1.0)
        ag = jnp.maximum(ag, ag.T)
        ag = ag * (1.0 - jnp.eye(N, dtype=jnp.float32))
        a = a.at[g].set(ag)

    # each grid step == one single-graph forward (batch == zeros per graph)
    batch = jnp.zeros((N,), jnp.int32)  # noqa: F841

    params = init_params(kp, CLASS_NUM, HIDDEN)

    out = gcn_forward(x, a, params, HIDDEN)
    out = jax.block_until_ready(out)
    assert out.shape == (G, HIDDEN), out.shape
    assert bool(jnp.all(jnp.isfinite(out)))
    print("KERNEL_OK")
</pallas_src>

<mosaic_0001>
module attributes {stable_mosaic.version = 11 : i64} {
  func.func @kernel(%arg0: i32, %arg1: memref<1x16x16xf32, #tpu.memory_space<vmem>>, %arg2: memref<1x16x128xf32, #tpu.memory_space<vmem>>, %arg3: memref<4x128x128xf32, #tpu.memory_space<vmem>>, %arg4: memref<4x8x128xf32, #tpu.memory_space<vmem>>, %arg5: memref<4x8x128xf32, #tpu.memory_space<vmem>>, %arg6: memref<1x8x128xf32, #tpu.memory_space<vmem>>) attributes {dimension_semantics = [#tpu.dimension_semantics<parallel>], iteration_bounds = array<i64: 2>, scalar_prefetch = 0 : i64, scratch_operands = 0 : i64, tpu.core_type = #tpu.core_type<tc>, window_params = [{transform_indices = @transform_0, window_bounds = array<i64: 1, 16, 16>}, {transform_indices = @transform_1, window_bounds = array<i64: 1, 16, 128>}, {pipeline_mode = #tpu.pipeline_mode<synchronous>, transform_indices = @transform_2, window_bounds = array<i64: 4, 128, 128>}, {pipeline_mode = #tpu.pipeline_mode<synchronous>, transform_indices = @transform_3, window_bounds = array<i64: 4, 8, 128>}, {pipeline_mode = #tpu.pipeline_mode<synchronous>, transform_indices = @transform_4, window_bounds = array<i64: 4, 8, 128>}, {transform_indices = @transform_5, window_bounds = array<i64: 1, 8, 128>}]} {
    %c0 = arith.constant 0 : index
    %c0_0 = arith.constant 0 : index
    %c0_1 = arith.constant 0 : index
    %0 = vector.load %arg1[%c0, %c0_0, %c0_1] : memref<1x16x16xf32, #tpu.memory_space<vmem>>, vector<1x16x16xf32>
    %1 = vector.shape_cast %0 : vector<1x16x16xf32> to vector<16x16xf32>
    %c0_2 = arith.constant 0 : index
    %c0_3 = arith.constant 0 : index
    %c0_4 = arith.constant 0 : index
    %2 = vector.load %arg2[%c0_2, %c0_3, %c0_4] : memref<1x16x128xf32, #tpu.memory_space<vmem>>, vector<1x16x128xf32>
    %3 = vector.shape_cast %2 : vector<1x16x128xf32> to vector<16x128xf32>
    %4 = tpu.iota {dimensions = array<i32: 0>} : vector<16x16xi32>
    %5 = tpu.iota {dimensions = array<i32: 1>} : vector<16x16xi32>
    %cst = arith.constant 1.000000e+00 : f32
    %6 = vector.broadcast %cst : f32 to vector<16x128xf32>
    %7 = tpu.iota {dimensions = array<i32: 0>} : vector<16x128xi32>
    %c16_i32 = arith.constant 16 : i32
    %8 = vector.broadcast %c16_i32 : i32 to vector<16x128xi32>
    %9 = arith.cmpi slt, %7, %8 : vector<16x128xi32>
    %10 = arith.extui %9 : vector<16x128xi1> to vector<16x128xi32>
    %11 = arith.sitofp %10 : vector<16x128xi32> to vector<16x128xf32>
    %c0_5 = arith.constant 0 : index
    %c0_6 = arith.constant 0 : index
    %c0_7 = arith.constant 0 : index
    %12 = vector.load %arg4[%c0_5, %c0_6, %c0_7] : memref<4x8x128xf32, #tpu.memory_space<vmem>>, vector<1x8x128xf32>
    %13 = vector.shape_cast %12 : vector<1x8x128xf32> to vector<8x128xf32>
    %14 = vector.extract_strided_slice %13 {offsets = [0, 0], sizes = [1, 128], strides = [1, 1]} : vector<8x128xf32> to vector<1x128xf32>
    %15 = vector.extract_strided_slice %13 {offsets = [1, 0], sizes = [1, 128], strides = [1, 1]} : vector<8x128xf32> to vector<1x128xf32>
    %16 = vector.extract_strided_slice %13 {offsets = [2, 0], sizes = [1, 128], strides = [1, 1]} : vector<8x128xf32> to vector<1x128xf32>
    %c0_8 = arith.constant 0 : index
    %c0_9 = arith.constant 0 : index
    %c0_10 = arith.constant 0 : index
    %17 = vector.load %arg5[%c0_8, %c0_9, %c0_10] : memref<4x8x128xf32, #tpu.memory_space<vmem>>, vector<1x8x128xf32>
    %18 = vector.shape_cast %17 : vector<1x8x128xf32> to vector<8x128xf32>
    %19 = vector.extract_strided_slice %18 {offsets = [0, 0], sizes = [1, 128], strides = [1, 1]} : vector<8x128xf32> to vector<1x128xf32>
    %20 = vector.extract_strided_slice %18 {offsets = [1, 0], sizes = [1, 128], strides = [1, 1]} : vector<8x128xf32> to vector<1x128xf32>
    %21 = vector.extract_strided_slice %18 {offsets = [2, 0], sizes = [1, 1], strides = [1, 1]} : vector<8x128xf32> to vector<1x1xf32>
    %cst_11 = arith.constant dense<0.000000e+00> : vector<16x128xf32>
    %22 = tpu.matmul %1, %11, %cst_11 {dimension_numbers = #tpu.dot_dimension_numbers<[1], [0], [0], [1], [0, 0, 1, 1], [], []>} : vector<16x16xf32>, vector<16x128xf32>, vector<16x128xf32> -> vector<16x128xf32>
    %23 = vector.extract_strided_slice %22 {offsets = [0, 0], sizes = [16, 1], strides = [1, 1]} : vector<16x128xf32> to vector<16x1xf32>
    %cst_12 = arith.constant 1.000000e+00 : f32
    %24 = vector.broadcast %cst_12 : f32 to vector<16x1xf32>
    %25 = arith.addf %23, %24 : vector<16x1xf32>
    %26 = math.rsqrt %25 : vector<16x1xf32>
    %c0_13 = arith.constant 0 : index
    %c0_14 = arith.constant 0 : index
    %c0_15 = arith.constant 0 : index
    %27 = vector.load %arg3[%c0_13, %c0_14, %c0_15] : memref<4x128x128xf32, #tpu.memory_space<vmem>>, vector<1x128x128xf32>
    %28 = vector.shape_cast %27 : vector<1x128x128xf32> to vector<128x128xf32>
    %cst_16 = arith.constant dense<0.000000e+00> : vector<16x128xf32>
    %29 = tpu.matmul %3, %28, %cst_16 {dimension_numbers = #tpu.dot_dimension_numbers<[1], [0], [0], [1], [0, 0, 1, 1], [], []>} : vector<16x128xf32>, vector<128x128xf32>, vector<16x128xf32> -> vector<16x128xf32>
    %30 = vector.broadcast %26 : vector<16x1xf32> to vector<16x128xf32>
    %31 = arith.mulf %29, %30 : vector<16x128xf32>
    %cst_17 = arith.constant dense<0.000000e+00> : vector<16x128xf32>
    %32 = tpu.matmul %1, %31, %cst_17 {dimension_numbers = #tpu.dot_dimension_numbers<[1], [0], [0], [1], [0, 0, 1, 1], [], []>} : vector<16x16xf32>, vector<16x128xf32>, vector<16x128xf32> -> vector<16x128xf32>
    %33 = vector.broadcast %26 : vector<16x1xf32> to vector<16x128xf32>
    %34 = arith.mulf %33, %32 : vector<16x128xf32>
    %35 = arith.mulf %26, %26 : vector<16x1xf32>
    %36 = vector.broadcast %35 : vector<16x1xf32> to vector<16x128xf32>
    %37 = arith.mulf %29, %36 : vector<16x128xf32>
    %38 = arith.addf %34, %37 : vector<16x128xf32>
    %39 = vector.broadcast %14 : vector<1x128xf32> to vector<16x128xf32>
    %40 = arith.addf %38, %39 : vector<16x128xf32>
    %cst_18 = arith.constant 0.000000e+00 : f32
    %41 = vector.broadcast %cst_18 : f32 to vector<16x128xf32>
    %42 = arith.maximumf %40, %41 : vector<16x128xf32>
    %43 = arith.mulf %42, %11 : vector<16x128xf32>
    %cst_19 = arith.constant dense<0.000000e+00> : vector<128xf32>
    %44 = vector.multi_reduction <add>, %43, %cst_19 [0] : vector<16x128xf32> to vector<128xf32>
    %45 = vector.shape_cast %44 : vector<128xf32> to vector<1x128xf32>
    %cst_20 = arith.constant 6.250000e-02 : f32
    %46 = vector.broadcast %cst_20 : f32 to vector<1x128xf32>
    %47 = arith.mulf %45, %46 : vector<1x128xf32>
    %48 = vector.broadcast %47 : vector<1x128xf32> to vector<16x128xf32>
    %49 = arith.subf %42, %48 : vector<16x128xf32>
    %50 = arith.mulf %49, %11 : vector<16x128xf32>
    %51 = arith.mulf %50, %50 : vector<16x128xf32>
    %cst_21 = arith.constant dense<0.000000e+00> : vector<128xf32>
    %52 = vector.multi_reduction <add>, %51, %cst_21 [0] : vector<16x128xf32> to vector<128xf32>
    %53 = vector.shape_cast %52 : vector<128xf32> to vector<1x128xf32>
    %cst_22 = arith.constant 6.250000e-02 : f32
    %54 = vector.broadcast %cst_22 : f32 to vector<1x128xf32>
    %55 = arith.mulf %53, %54 : vector<1x128xf32>
    %56 = vector.broadcast %47 : vector<1x128xf32> to vector<16x128xf32>
    %57 = arith.subf %42, %56 : vector<16x128xf32>
    %cst_23 = arith.constant 9.99999974E-6 : f32
    %58 = vector.broadcast %cst_23 : f32 to vector<1x128xf32>
    %59 = arith.addf %55, %58 : vector<1x128xf32>
    %60 = math.rsqrt %59 : vector<1x128xf32>
    %61 = vector.broadcast %60 : vector<1x128xf32> to vector<16x128xf32>
    %62 = arith.mulf %57, %61 : vector<16x128xf32>
    %63 = vector.broadcast %15 : vector<1x128xf32> to vector<16x128xf32>
    %64 = arith.mulf %62, %63 : vector<16x128xf32>
    %65 = vector.broadcast %16 : vector<1x128xf32> to vector<16x128xf32>
    %66 = arith.addf %64, %65 : vector<16x128xf32>
    %67 = arith.mulf %66, %11 : vector<16x128xf32>
    %cst_24 = arith.constant dense<0.000000e+00> : vector<16x128xf32>
    %68 = tpu.matmul %1, %67, %cst_24 {dimension_numbers = #tpu.dot_dimension_numbers<[1], [0], [0], [1], [0, 0, 1, 1], [], []>} : vector<16x16xf32>, vector<16x128xf32>, vector<16x128xf32> -> vector<16x128xf32>
    %69 = vector.broadcast %19 : vector<1x128xf32> to vector<16x128xf32>
    %70 = arith.mulf %68, %69 : vector<16x128xf32>
    %71 = vector.broadcast %20 : vector<1x128xf32> to vector<16x128xf32>
    %72 = arith.mulf %66, %71 : vector<16x128xf32>
    %73 = arith.addf %70, %72 : vector<16x128xf32>
    %cst_25 = arith.constant 0.000000e+00 : f32
    %74 = vector.broadcast %cst_25 : f32 to vector<16x128xf32>
    %75 = arith.cmpf ogt, %11, %74 : vector<16x128xf32>
    %cst_26 = arith.constant -7.812500e+27 : f32
    %76 = vector.broadcast %cst_26 : f32 to vector<16x128xf32>
    %77 = arith.select %75, %73, %76 : vector<16x128xi1>, vector<16x128xf32>
    %cst_27 = arith.constant dense<0.000000e+00> : vector<16x16xf32>
    %78 = tpu.matmul %6, %77, %cst_27 {dimension_numbers = #tpu.dot_dimension_numbers<[1], [1], [0], [0], [0, 0, 1, 0], [], []>} : vector<16x128xf32>, vector<16x128xf32>, vector<16x16xf32> -> vector<16x16xf32>
    %cst_28 = arith.constant dense<0.000000e+00> : vector<16x16xf32>
    %79 = tpu.matmul %77, %6, %cst_28 {dimension_numbers = #tpu.dot_dimension_numbers<[1], [1], [0], [0], [0, 0, 1, 0], [], []>} : vector<16x128xf32>, vector<16x128xf32>, vector<16x16xf32> -> vector<16x16xf32>
    %80 = arith.cmpf ogt, %78, %79 : vector<16x16xf32>
    %81 = arith.cmpf oeq, %78, %79 : vector<16x16xf32>
    %82 = arith.cmpi slt, %5, %4 : vector<16x16xi32>
    %83 = arith.andi %81, %82 : vector<16x16xi1>
    %84 = arith.ori %80, %83 : vector<16x16xi1>
    %85 = arith.extui %84 : vector<16x16xi1> to vector<16x16xi32>
    %86 = arith.sitofp %85 : vector<16x16xi32> to vector<16x16xf32>
    %cst_29 = arith.constant dense<0.000000e+00> : vector<16xf32>
    %87 = vector.multi_reduction <add>, %86, %cst_29 [1] : vector<16x16xf32> to vector<16xf32>
    %88 = vector.shape_cast %87 : vector<16xf32> to vector<16x1xf32>
    %cst_30 = arith.constant 8.000000e+00 : f32
    %89 = vector.broadcast %cst_30 : f32 to vector<16x1xf32>
    %90 = arith.cmpf olt, %88, %89 : vector<16x1xf32>
    %cst_31 = arith.constant 0.000000e+00 : f32
    %91 = vector.broadcast %cst_31 : f32 to vector<16x128xf32>
    %92 = arith.cmpf ogt, %11, %91 : vector<16x128xf32>
    %93 = vector.broadcast %90 : vector<16x1xi1> to vector<16x128xi1>
    %94 = arith.andi %93, %92 : vector<16x128xi1>
    %95 = arith.extui %94 : vector<16x128xi1> to vector<16x128xi32>
    %96 = arith.sitofp %95 : vector<16x128xi32> to vector<16x128xf32>
    %97 = vector.extract_strided_slice %79 {offsets = [0, 0], sizes = [16, 1], strides = [1, 1]} : vector<16x16xf32> to vector<16x1xf32>
    %98 = vector.broadcast %21 : vector<1x1xf32> to vector<16x1xf32>
    %99 = arith.addf %97, %98 : vector<16x1xf32>
    %100 = math.tanh %99 : vector<16x1xf32>
    %101 = vector.broadcast %100 : vector<16x1xf32> to vector<16x128xf32>
    %102 = arith.mulf %66, %101 : vector<16x128xf32>
    %103 = arith.mulf %102, %96 : vector<16x128xf32>
    %c1 = arith.constant 1 : index
    %c0_32 = arith.constant 0 : index
    %c0_33 = arith.constant 0 : index
    %104 = vector.load %arg4[%c1, %c0_32, %c0_33] : memref<4x8x128xf32, #tpu.memory_space<vmem>>, vector<1x8x128xf32>
    %105 = vector.shape_cast %104 : vector<1x8x128xf32> to vector<8x128xf32>
    %106 = vector.extract_strided_slice %105 {offsets = [0, 0], sizes = [1, 128], strides = [1, 1]} : vector<8x128xf32> to vector<1x128xf32>
    %107 = vector.extract_strided_slice %105 {offsets = [1, 0], sizes = [1, 128], strides = [1, 1]} : vector<8x128xf32> to vector<1x128xf32>
    %108 = vector.extract_strided_slice %105 {offsets = [2, 0], sizes = [1, 128], strides = [1, 1]} : vector<8x128xf32> to vector<1x128xf32>
    %c1_34 = arith.constant 1 : index
    %c0_35 = arith.constant 0 : index
    %c0_36 = arith.constant 0 : index
    %109 = vector.load %arg5[%c1_34, %c0_35, %c0_36] : memref<4x8x128xf32, #tpu.memory_space<vmem>>, vector<1x8x128xf32>
    %110 = vector.shape_cast %109 : vector<1x8x128xf32> to vector<8x128xf32>
    %111 = vector.extract_strided_slice %110 {offsets = [0, 0], sizes = [1, 128], strides = [1, 1]} : vector<8x128xf32> to vector<1x128xf32>
    %112 = vector.extract_strided_slice %110 {offsets = [1, 0], sizes = [1, 128], strides = [1, 1]} : vector<8x128xf32> to vector<1x128xf32>
    %113 = vector.extract_strided_slice %110 {offsets = [2, 0], sizes = [1, 1], strides = [1, 1]} : vector<8x128xf32> to vector<1x1xf32>
    %cst_37 = arith.constant dense<0.000000e+00> : vector<16x128xf32>
    %114 = tpu.matmul %1, %96, %cst_37 {dimension_numbers = #tpu.dot_dimension_numbers<[1], [0], [0], [1], [0, 0, 1, 1], [], []>} : vector<16x16xf32>, vector<16x128xf32>, vector<16x128xf32> -> vector<16x128xf32>
    %115 = vector.extract_strided_slice %114 {offsets = [0, 0], sizes = [16, 1], strides = [1, 1]} : vector<16x128xf32> to vector<16x1xf32>
    %cst_38 = arith.constant 1.000000e+00 : f32
    %116 = vector.broadcast %cst_38 : f32 to vector<16x1xf32>
    %117 = arith.addf %115, %116 : vector<16x1xf32>
    %118 = math.rsqrt %117 : vector<16x1xf32>
    %c1_39 = arith.constant 1 : index
    %c0_40 = arith.constant 0 : index
    %c0_41 = arith.constant 0 : index
    %119 = vector.load %arg3[%c1_39, %c0_40, %c0_41] : memref<4x128x128xf32, #tpu.memory_space<vmem>>, vector<1x128x128xf32>
    %120 = vector.shape_cast %119 : vector<1x128x128xf32> to vector<128x128xf32>
    %cst_42 = arith.constant dense<0.000000e+00> : vector<16x128xf32>
    %121 = tpu.matmul %103, %120, %cst_42 {dimension_numbers = #tpu.dot_dimension_numbers<[1], [0], [0], [1], [0, 0, 1, 1], [], []>} : vector<16x128xf32>, vector<128x128xf32>, vector<16x128xf32> -> vector<16x128xf32>
    %122 = vector.broadcast %118 : vector<16x1xf32> to vector<16x128xf32>
    %123 = arith.mulf %121, %122 : vector<16x128xf32>
    %cst_43 = arith.constant dense<0.000000e+00> : vector<16x128xf32>
    %124 = tpu.matmul %1, %123, %cst_43 {dimension_numbers = #tpu.dot_dimension_numbers<[1], [0], [0], [1], [0, 0, 1, 1], [], []>} : vector<16x16xf32>, vector<16x128xf32>, vector<16x128xf32> -> vector<16x128xf32>
    %125 = vector.broadcast %118 : vector<16x1xf32> to vector<16x128xf32>
    %126 = arith.mulf %125, %124 : vector<16x128xf32>
    %127 = arith.mulf %118, %118 : vector<16x1xf32>
    %128 = vector.broadcast %127 : vector<16x1xf32> to vector<16x128xf32>
    %129 = arith.mulf %121, %128 : vector<16x128xf32>
    %130 = arith.addf %126, %129 : vector<16x128xf32>
    %131 = vector.broadcast %106 : vector<1x128xf32> to vector<16x128xf32>
    %132 = arith.addf %130, %131 : vector<16x128xf32>
    %cst_44 = arith.constant 0.000000e+00 : f32
    %133 = vector.broadcast %cst_44 : f32 to vector<16x128xf32>
    %134 = arith.maximumf %132, %133 : vector<16x128xf32>
    %135 = arith.mulf %134, %96 : vector<16x128xf32>
    %cst_45 = arith.constant dense<0.000000e+00> : vector<128xf32>
    %136 = vector.multi_reduction <add>, %135, %cst_45 [0] : vector<16x128xf32> to vector<128xf32>
    %137 = vector.shape_cast %136 : vector<128xf32> to vector<1x128xf32>
    %cst_46 = arith.constant 1.250000e-01 : f32
    %138 = vector.broadcast %cst_46 : f32 to vector<1x128xf32>
    %139 = arith.mulf %137, %138 : vector<1x128xf32>
    %140 = vector.broadcast %139 : vector<1x128xf32> to vector<16x128xf32>
    %141 = arith.subf %134, %140 : vector<16x128xf32>
    %142 = arith.mulf %141, %96 : vector<16x128xf32>
    %143 = arith.mulf %142, %142 : vector<16x128xf32>
    %cst_47 = arith.constant dense<0.000000e+00> : vector<128xf32>
    %144 = vector.multi_reduction <add>, %143, %cst_47 [0] : vector<16x128xf32> to vector<128xf32>
    %145 = vector.shape_cast %144 : vector<128xf32> to vector<1x128xf32>
    %cst_48 = arith.constant 1.250000e-01 : f32
    %146 = vector.broadcast %cst_48 : f32 to vector<1x128xf32>
    %147 = arith.mulf %145, %146 : vector<1x128xf32>
    %148 = vector.broadcast %139 : vector<1x128xf32> to vector<16x128xf32>
    %149 = arith.subf %134, %148 : vector<16x128xf32>
    %cst_49 = arith.constant 9.99999974E-6 : f32
    %150 = vector.broadcast %cst_49 : f32 to vector<1x128xf32>
    %151 = arith.addf %147, %150 : vector<1x128xf32>
    %152 = math.rsqrt %151 : vector<1x128xf32>
    %153 = vector.broadcast %152 : vector<1x128xf32> to vector<16x128xf32>
    %154 = arith.mulf %149, %153 : vector<16x128xf32>
    %155 = vector.broadcast %107 : vector<1x128xf32> to vector<16x128xf32>
    %156 = arith.mulf %154, %155 : vector<16x128xf32>
    %157 = vector.broadcast %108 : vector<1x128xf32> to vector<16x128xf32>
    %158 = arith.addf %156, %157 : vector<16x128xf32>
    %159 = arith.mulf %158, %96 : vector<16x128xf32>
    %cst_50 = arith.constant dense<0.000000e+00> : vector<16x128xf32>
    %160 = tpu.matmul %1, %159, %cst_50 {dimension_numbers = #tpu.dot_dimension_numbers<[1], [0], [0], [1], [0, 0, 1, 1], [], []>} : vector<16x16xf32>, vector<16x128xf32>, vector<16x128xf32> -> vector<16x128xf32>
    %161 = vector.broadcast %111 : vector<1x128xf32> to vector<16x128xf32>
    %162 = arith.mulf %160, %161 : vector<16x128xf32>
    %163 = vector.broadcast %112 : vector<1x128xf32> to vector<16x128xf32>
    %164 = arith.mulf %158, %163 : vector<16x128xf32>
    %165 = arith.addf %162, %164 : vector<16x128xf32>
    %cst_51 = arith.constant 0.000000e+00 : f32
    %166 = vector.broadcast %cst_51 : f32 to vector<16x128xf32>
    %167 = arith.cmpf ogt, %96, %166 : vector<16x128xf32>
    %cst_52 = arith.constant -7.812500e+27 : f32
    %168 = vector.broadcast %cst_52 : f32 to vector<16x128xf32>
    %169 = arith.select %167, %165, %168 : vector<16x128xi1>, vector<16x128xf32>
    %cst_53 = arith.constant dense<0.000000e+00> : vector<16x16xf32>
    %170 = tpu.matmul %6, %169, %cst_53 {dimension_numbers = #tpu.dot_dimension_numbers<[1], [1], [0], [0], [0, 0, 1, 0], [], []>} : vector<16x128xf32>, vector<16x128xf32>, vector<16x16xf32> -> vector<16x16xf32>
    %cst_54 = arith.constant dense<0.000000e+00> : vector<16x16xf32>
    %171 = tpu.matmul %169, %6, %cst_54 {dimension_numbers = #tpu.dot_dimension_numbers<[1], [1], [0], [0], [0, 0, 1, 0], [], []>} : vector<16x128xf32>, vector<16x128xf32>, vector<16x16xf32> -> vector<16x16xf32>
    %172 = arith.cmpf ogt, %170, %171 : vector<16x16xf32>
    %173 = arith.cmpf oeq, %170, %171 : vector<16x16xf32>
    %174 = arith.cmpi slt, %5, %4 : vector<16x16xi32>
    %175 = arith.andi %173, %174 : vector<16x16xi1>
    %176 = arith.ori %172, %175 : vector<16x16xi1>
    %177 = arith.extui %176 : vector<16x16xi1> to vector<16x16xi32>
    %178 = arith.sitofp %177 : vector<16x16xi32> to vector<16x16xf32>
    %cst_55 = arith.constant dense<0.000000e+00> : vector<16xf32>
    %179 = vector.multi_reduction <add>, %178, %cst_55 [1] : vector<16x16xf32> to vector<16xf32>
    %180 = vector.shape_cast %179 : vector<16xf32> to vector<16x1xf32>
    %cst_56 = arith.constant 4.000000e+00 : f32
    %181 = vector.broadcast %cst_56 : f32 to vector<16x1xf32>
    %182 = arith.cmpf olt, %180, %181 : vector<16x1xf32>
    %cst_57 = arith.constant 0.000000e+00 : f32
    %183 = vector.broadcast %cst_57 : f32 to vector<16x128xf32>
    %184 = arith.cmpf ogt, %96, %183 : vector<16x128xf32>
    %185 = vector.broadcast %182 : vector<16x1xi1> to vector<16x128xi1>
    %186 = arith.andi %185, %184 : vector<16x128xi1>
    %187 = arith.extui %186 : vector<16x128xi1> to vector<16x128xi32>
    %188 = arith.sitofp %187 : vector<16x128xi32> to vector<16x128xf32>
    %189 = vector.extract_strided_slice %171 {offsets = [0, 0], sizes = [16, 1], strides = [1, 1]} : vector<16x16xf32> to vector<16x1xf32>
    %190 = vector.broadcast %113 : vector<1x1xf32> to vector<16x1xf32>
    %191 = arith.addf %189, %190 : vector<16x1xf32>
    %192 = math.tanh %191 : vector<16x1xf32>
    %193 = vector.broadcast %192 : vector<16x1xf32> to vector<16x128xf32>
    %194 = arith.mulf %158, %193 : vector<16x128xf32>
    %195 = arith.mulf %194, %188 : vector<16x128xf32>
    %c2 = arith.constant 2 : index
    %c0_58 = arith.constant 0 : index
    %c0_59 = arith.constant 0 : index
    %196 = vector.load %arg4[%c2, %c0_58, %c0_59] : memref<4x8x128xf32, #tpu.memory_space<vmem>>, vector<1x8x128xf32>
    %197 = vector.shape_cast %196 : vector<1x8x128xf32> to vector<8x128xf32>
    %198 = vector.extract_strided_slice %197 {offsets = [0, 0], sizes = [1, 128], strides = [1, 1]} : vector<8x128xf32> to vector<1x128xf32>
    %199 = vector.extract_strided_slice %197 {offsets = [1, 0], sizes = [1, 128], strides = [1, 1]} : vector<8x128xf32> to vector<1x128xf32>
    %200 = vector.extract_strided_slice %197 {offsets = [2, 0], sizes = [1, 128], strides = [1, 1]} : vector<8x128xf32> to vector<1x128xf32>
    %c2_60 = arith.constant 2 : index
    %c0_61 = arith.constant 0 : index
    %c0_62 = arith.constant 0 : index
    %201 = vector.load %arg5[%c2_60, %c0_61, %c0_62] : memref<4x8x128xf32, #tpu.memory_space<vmem>>, vector<1x8x128xf32>
    %202 = vector.shape_cast %201 : vector<1x8x128xf32> to vector<8x128xf32>
    %203 = vector.extract_strided_slice %202 {offsets = [0, 0], sizes = [1, 128], strides = [1, 1]} : vector<8x128xf32> to vector<1x128xf32>
    %204 = vector.extract_strided_slice %202 {offsets = [1, 0], sizes = [1, 128], strides = [1, 1]} : vector<8x128xf32> to vector<1x128xf32>
    %205 = vector.extract_strided_slice %202 {offsets = [2, 0], sizes = [1, 1], strides = [1, 1]} : vector<8x128xf32> to vector<1x1xf32>
    %cst_63 = arith.constant dense<0.000000e+00> : vector<16x128xf32>
    %206 = tpu.matmul %1, %188, %cst_63 {dimension_numbers = #tpu.dot_dimension_numbers<[1], [0], [0], [1], [0, 0, 1, 1], [], []>} : vector<16x16xf32>, vector<16x128xf32>, vector<16x128xf32> -> vector<16x128xf32>
    %207 = vector.extract_strided_slice %206 {offsets = [0, 0], sizes = [16, 1], strides = [1, 1]} : vector<16x128xf32> to vector<16x1xf32>
    %cst_64 = arith.constant 1.000000e+00 : f32
    %208 = vector.broadcast %cst_64 : f32 to vector<16x1xf32>
    %209 = arith.addf %207, %208 : vector<16x1xf32>
    %210 = math.rsqrt %209 : vector<16x1xf32>
    %c2_65 = arith.constant 2 : index
    %c0_66 = arith.constant 0 : index
    %c0_67 = arith.constant 0 : index
    %211 = vector.load %arg3[%c2_65, %c0_66, %c0_67] : memref<4x128x128xf32, #tpu.memory_space<vmem>>, vector<1x128x128xf32>
    %212 = vector.shape_cast %211 : vector<1x128x128xf32> to vector<128x128xf32>
    %cst_68 = arith.constant dense<0.000000e+00> : vector<16x128xf32>
    %213 = tpu.matmul %195, %212, %cst_68 {dimension_numbers = #tpu.dot_dimension_numbers<[1], [0], [0], [1], [0, 0, 1, 1], [], []>} : vector<16x128xf32>, vector<128x128xf32>, vector<16x128xf32> -> vector<16x128xf32>
    %214 = vector.broadcast %210 : vector<16x1xf32> to vector<16x128xf32>
    %215 = arith.mulf %213, %214 : vector<16x128xf32>
    %cst_69 = arith.constant dense<0.000000e+00> : vector<16x128xf32>
    %216 = tpu.matmul %1, %215, %cst_69 {dimension_numbers = #tpu.dot_dimension_numbers<[1], [0], [0], [1], [0, 0, 1, 1], [], []>} : vector<16x16xf32>, vector<16x128xf32>, vector<16x128xf32> -> vector<16x128xf32>
    %217 = vector.broadcast %210 : vector<16x1xf32> to vector<16x128xf32>
    %218 = arith.mulf %217, %216 : vector<16x128xf32>
    %219 = arith.mulf %210, %210 : vector<16x1xf32>
    %220 = vector.broadcast %219 : vector<16x1xf32> to vector<16x128xf32>
    %221 = arith.mulf %213, %220 : vector<16x128xf32>
    %222 = arith.addf %218, %221 : vector<16x128xf32>
    %223 = vector.broadcast %198 : vector<1x128xf32> to vector<16x128xf32>
    %224 = arith.addf %222, %223 : vector<16x128xf32>
    %cst_70 = arith.constant 0.000000e+00 : f32
    %225 = vector.broadcast %cst_70 : f32 to vector<16x128xf32>
    %226 = arith.maximumf %224, %225 : vector<16x128xf32>
    %227 = arith.mulf %226, %188 : vector<16x128xf32>
    %cst_71 = arith.constant dense<0.000000e+00> : vector<128xf32>
    %228 = vector.multi_reduction <add>, %227, %cst_71 [0] : vector<16x128xf32> to vector<128xf32>
    %229 = vector.shape_cast %228 : vector<128xf32> to vector<1x128xf32>
    %cst_72 = arith.constant 2.500000e-01 : f32
    %230 = vector.broadcast %cst_72 : f32 to vector<1x128xf32>
    %231 = arith.mulf %229, %230 : vector<1x128xf32>
    %232 = vector.broadcast %231 : vector<1x128xf32> to vector<16x128xf32>
    %233 = arith.subf %226, %232 : vector<16x128xf32>
    %234 = arith.mulf %233, %188 : vector<16x128xf32>
    %235 = arith.mulf %234, %234 : vector<16x128xf32>
    %cst_73 = arith.constant dense<0.000000e+00> : vector<128xf32>
    %236 = vector.multi_reduction <add>, %235, %cst_73 [0] : vector<16x128xf32> to vector<128xf32>
    %237 = vector.shape_cast %236 : vector<128xf32> to vector<1x128xf32>
    %cst_74 = arith.constant 2.500000e-01 : f32
    %238 = vector.broadcast %cst_74 : f32 to vector<1x128xf32>
    %239 = arith.mulf %237, %238 : vector<1x128xf32>
    %240 = vector.broadcast %231 : vector<1x128xf32> to vector<16x128xf32>
    %241 = arith.subf %226, %240 : vector<16x128xf32>
    %cst_75 = arith.constant 9.99999974E-6 : f32
    %242 = vector.broadcast %cst_75 : f32 to vector<1x128xf32>
    %243 = arith.addf %239, %242 : vector<1x128xf32>
    %244 = math.rsqrt %243 : vector<1x128xf32>
    %245 = vector.broadcast %244 : vector<1x128xf32> to vector<16x128xf32>
    %246 = arith.mulf %241, %245 : vector<16x128xf32>
    %247 = vector.broadcast %199 : vector<1x128xf32> to vector<16x128xf32>
    %248 = arith.mulf %246, %247 : vector<16x128xf32>
    %249 = vector.broadcast %200 : vector<1x128xf32> to vector<16x128xf32>
    %250 = arith.addf %248, %249 : vector<16x128xf32>
    %251 = arith.mulf %250, %188 : vector<16x128xf32>
    %cst_76 = arith.constant dense<0.000000e+00> : vector<16x128xf32>
    %252 = tpu.matmul %1, %251, %cst_76 {dimension_numbers = #tpu.dot_dimension_numbers<[1], [0], [0], [1], [0, 0, 1, 1], [], []>} : vector<16x16xf32>, vector<16x128xf32>, vector<16x128xf32> -> vector<16x128xf32>
    %253 = vector.broadcast %203 : vector<1x128xf32> to vector<16x128xf32>
    %254 = arith.mulf %252, %253 : vector<16x128xf32>
    %255 = vector.broadcast %204 : vector<1x128xf32> to vector<16x128xf32>
    %256 = arith.mulf %250, %255 : vector<16x128xf32>
    %257 = arith.addf %254, %256 : vector<16x128xf32>
    %cst_77 = arith.constant 0.000000e+00 : f32
    %258 = vector.broadcast %cst_77 : f32 to vector<16x128xf32>
    %259 = arith.cmpf ogt, %188, %258 : vector<16x128xf32>
    %cst_78 = arith.constant -7.812500e+27 : f32
    %260 = vector.broadcast %cst_78 : f32 to vector<16x128xf32>
    %261 = arith.select %259, %257, %260 : vector<16x128xi1>, vector<16x128xf32>
    %cst_79 = arith.constant dense<0.000000e+00> : vector<16x16xf32>
    %262 = tpu.matmul %6, %261, %cst_79 {dimension_numbers = #tpu.dot_dimension_numbers<[1], [1], [0], [0], [0, 0, 1, 0], [], []>} : vector<16x128xf32>, vector<16x128xf32>, vector<16x16xf32> -> vector<16x16xf32>
    %cst_80 = arith.constant dense<0.000000e+00> : vector<16x16xf32>
    %263 = tpu.matmul %261, %6, %cst_80 {dimension_numbers = #tpu.dot_dimension_numbers<[1], [1], [0], [0], [0, 0, 1, 0], [], []>} : vector<16x128xf32>, vector<16x128xf32>, vector<16x16xf32> -> vector<16x16xf32>
    %264 = arith.cmpf ogt, %262, %263 : vector<16x16xf32>
    %265 = arith.cmpf oeq, %262, %263 : vector<16x16xf32>
    %266 = arith.cmpi slt, %5, %4 : vector<16x16xi32>
    %267 = arith.andi %265, %266 : vector<16x16xi1>
    %268 = arith.ori %264, %267 : vector<16x16xi1>
    %269 = arith.extui %268 : vector<16x16xi1> to vector<16x16xi32>
    %270 = arith.sitofp %269 : vector<16x16xi32> to vector<16x16xf32>
    %cst_81 = arith.constant dense<0.000000e+00> : vector<16xf32>
    %271 = vector.multi_reduction <add>, %270, %cst_81 [1] : vector<16x16xf32> to vector<16xf32>
    %272 = vector.shape_cast %271 : vector<16xf32> to vector<16x1xf32>
    %cst_82 = arith.constant 2.000000e+00 : f32
    %273 = vector.broadcast %cst_82 : f32 to vector<16x1xf32>
    %274 = arith.cmpf olt, %272, %273 : vector<16x1xf32>
    %cst_83 = arith.constant 0.000000e+00 : f32
    %275 = vector.broadcast %cst_83 : f32 to vector<16x128xf32>
    %276 = arith.cmpf ogt, %188, %275 : vector<16x128xf32>
    %277 = vector.broadcast %274 : vector<16x1xi1> to vector<16x128xi1>
    %278 = arith.andi %277, %276 : vector<16x128xi1>
    %279 = arith.extui %278 : vector<16x128xi1> to vector<16x128xi32>
    %280 = arith.sitofp %279 : vector<16x128xi32> to vector<16x128xf32>
    %281 = vector.extract_strided_slice %263 {offsets = [0, 0], sizes = [16, 1], strides = [1, 1]} : vector<16x16xf32> to vector<16x1xf32>
    %282 = vector.broadcast %205 : vector<1x1xf32> to vector<16x1xf32>
    %283 = arith.addf %281, %282 : vector<16x1xf32>
    %284 = math.tanh %283 : vector<16x1xf32>
    %285 = vector.broadcast %284 : vector<16x1xf32> to vector<16x128xf32>
    %286 = arith.mulf %250, %285 : vector<16x128xf32>
    %287 = arith.mulf %286, %280 : vector<16x128xf32>
    %c3 = arith.constant 3 : index
    %c0_84 = arith.constant 0 : index
    %c0_85 = arith.constant 0 : index
    %288 = vector.load %arg4[%c3, %c0_84, %c0_85] : memref<4x8x128xf32, #tpu.memory_space<vmem>>, vector<1x8x128xf32>
    %289 = vector.shape_cast %288 : vector<1x8x128xf32> to vector<8x128xf32>
    %290 = vector.extract_strided_slice %289 {offsets = [0, 0], sizes = [1, 128], strides = [1, 1]} : vector<8x128xf32> to vector<1x128xf32>
    %291 = vector.extract_strided_slice %289 {offsets = [1, 0], sizes = [1, 128], strides = [1, 1]} : vector<8x128xf32> to vector<1x128xf32>
    %292 = vector.extract_strided_slice %289 {offsets = [2, 0], sizes = [1, 128], strides = [1, 1]} : vector<8x128xf32> to vector<1x128xf32>
    %c3_86 = arith.constant 3 : index
    %c0_87 = arith.constant 0 : index
    %c0_88 = arith.constant 0 : index
    %293 = vector.load %arg5[%c3_86, %c0_87, %c0_88] : memref<4x8x128xf32, #tpu.memory_space<vmem>>, vector<1x8x128xf32>
    %294 = vector.shape_cast %293 : vector<1x8x128xf32> to vector<8x128xf32>
    %295 = vector.extract_strided_slice %294 {offsets = [0, 0], sizes = [1, 128], strides = [1, 1]} : vector<8x128xf32> to vector<1x128xf32>
    %296 = vector.extract_strided_slice %294 {offsets = [1, 0], sizes = [1, 128], strides = [1, 1]} : vector<8x128xf32> to vector<1x128xf32>
    %297 = vector.extract_strided_slice %294 {offsets = [2, 0], sizes = [1, 1], strides = [1, 1]} : vector<8x128xf32> to vector<1x1xf32>
    %cst_89 = arith.constant dense<0.000000e+00> : vector<16x128xf32>
    %298 = tpu.matmul %1, %280, %cst_89 {dimension_numbers = #tpu.dot_dimension_numbers<[1], [0], [0], [1], [0, 0, 1, 1], [], []>} : vector<16x16xf32>, vector<16x128xf32>, vector<16x128xf32> -> vector<16x128xf32>
    %299 = vector.extract_strided_slice %298 {offsets = [0, 0], sizes = [16, 1], strides = [1, 1]} : vector<16x128xf32> to vector<16x1xf32>
    %cst_90 = arith.constant 1.000000e+00 : f32
    %300 = vector.broadcast %cst_90 : f32 to vector<16x1xf32>
    %301 = arith.addf %299, %300 : vector<16x1xf32>
    %302 = math.rsqrt %301 : vector<16x1xf32>
    %c3_91 = arith.constant 3 : index
    %c0_92 = arith.constant 0 : index
    %c0_93 = arith.constant 0 : index
    %303 = vector.load %arg3[%c3_91, %c0_92, %c0_93] : memref<4x128x128xf32, #tpu.memory_space<vmem>>, vector<1x128x128xf32>
    %304 = vector.shape_cast %303 : vector<1x128x128xf32> to vector<128x128xf32>
    %cst_94 = arith.constant dense<0.000000e+00> : vector<16x128xf32>
    %305 = tpu.matmul %287, %304, %cst_94 {dimension_numbers = #tpu.dot_dimension_numbers<[1], [0], [0], [1], [0, 0, 1, 1], [], []>} : vector<16x128xf32>, vector<128x128xf32>, vector<16x128xf32> -> vector<16x128xf32>
    %306 = vector.broadcast %302 : vector<16x1xf32> to vector<16x128xf32>
    %307 = arith.mulf %305, %306 : vector<16x128xf32>
    %cst_95 = arith.constant dense<0.000000e+00> : vector<16x128xf32>
    %308 = tpu.matmul %1, %307, %cst_95 {dimension_numbers = #tpu.dot_dimension_numbers<[1], [0], [0], [1], [0, 0, 1, 1], [], []>} : vector<16x16xf32>, vector<16x128xf32>, vector<16x128xf32> -> vector<16x128xf32>
    %309 = vector.broadcast %302 : vector<16x1xf32> to vector<16x128xf32>
    %310 = arith.mulf %309, %308 : vector<16x128xf32>
    %311 = arith.mulf %302, %302 : vector<16x1xf32>
    %312 = vector.broadcast %311 : vector<16x1xf32> to vector<16x128xf32>
    %313 = arith.mulf %305, %312 : vector<16x128xf32>
    %314 = arith.addf %310, %313 : vector<16x128xf32>
    %315 = vector.broadcast %290 : vector<1x128xf32> to vector<16x128xf32>
    %316 = arith.addf %314, %315 : vector<16x128xf32>
    %cst_96 = arith.constant 0.000000e+00 : f32
    %317 = vector.broadcast %cst_96 : f32 to vector<16x128xf32>
    %318 = arith.maximumf %316, %317 : vector<16x128xf32>
    %319 = arith.mulf %318, %280 : vector<16x128xf32>
    %cst_97 = arith.constant dense<0.000000e+00> : vector<128xf32>
    %320 = vector.multi_reduction <add>, %319, %cst_97 [0] : vector<16x128xf32> to vector<128xf32>
    %321 = vector.shape_cast %320 : vector<128xf32> to vector<1x128xf32>
    %cst_98 = arith.constant 5.000000e-01 : f32
    %322 = vector.broadcast %cst_98 : f32 to vector<1x128xf32>
    %323 = arith.mulf %321, %322 : vector<1x128xf32>
    %324 = vector.broadcast %323 : vector<1x128xf32> to vector<16x128xf32>
    %325 = arith.subf %318, %324 : vector<16x128xf32>
    %326 = arith.mulf %325, %280 : vector<16x128xf32>
    %327 = arith.mulf %326, %326 : vector<16x128xf32>
    %cst_99 = arith.constant dense<0.000000e+00> : vector<128xf32>
    %328 = vector.multi_reduction <add>, %327, %cst_99 [0] : vector<16x128xf32> to vector<128xf32>
    %329 = vector.shape_cast %328 : vector<128xf32> to vector<1x128xf32>
    %cst_100 = arith.constant 5.000000e-01 : f32
    %330 = vector.broadcast %cst_100 : f32 to vector<1x128xf32>
    %331 = arith.mulf %329, %330 : vector<1x128xf32>
    %332 = vector.broadcast %323 : vector<1x128xf32> to vector<16x128xf32>
    %333 = arith.subf %318, %332 : vector<16x128xf32>
    %cst_101 = arith.constant 9.99999974E-6 : f32
    %334 = vector.broadcast %cst_101 : f32 to vector<1x128xf32>
    %335 = arith.addf %331, %334 : vector<1x128xf32>
    %336 = math.rsqrt %335 : vector<1x128xf32>
    %337 = vector.broadcast %336 : vector<1x128xf32> to vector<16x128xf32>
    %338 = arith.mulf %333, %337 : vector<16x128xf32>
    %339 = vector.broadcast %291 : vector<1x128xf32> to vector<16x128xf32>
    %340 = arith.mulf %338, %339 : vector<16x128xf32>
    %341 = vector.broadcast %292 : vector<1x128xf32> to vector<16x128xf32>
    %342 = arith.addf %340, %341 : vector<16x128xf32>
    %343 = arith.mulf %342, %280 : vector<16x128xf32>
    %cst_102 = arith.constant dense<0.000000e+00> : vector<16x128xf32>
    %344 = tpu.matmul %1, %343, %cst_102 {dimension_numbers = #tpu.dot_dimension_numbers<[1], [0], [0], [1], [0, 0, 1, 1], [], []>} : vector<16x16xf32>, vector<16x128xf32>, vector<16x128xf32> -> vector<16x128xf32>
    %345 = vector.broadcast %295 : vector<1x128xf32> to vector<16x128xf32>
    %346 = arith.mulf %344, %345 : vector<16x128xf32>
    %347 = vector.broadcast %296 : vector<1x128xf32> to vector<16x128xf32>
    %348 = arith.mulf %342, %347 : vector<16x128xf32>
    %349 = arith.addf %346, %348 : vector<16x128xf32>
    %cst_103 = arith.constant 0.000000e+00 : f32
    %350 = vector.broadcast %cst_103 : f32 to vector<16x128xf32>
    %351 = arith.cmpf ogt, %280, %350 : vector<16x128xf32>
    %cst_104 = arith.constant -7.812500e+27 : f32
    %352 = vector.broadcast %cst_104 : f32 to vector<16x128xf32>
    %353 = arith.select %351, %349, %352 : vector<16x128xi1>, vector<16x128xf32>
    %cst_105 = arith.constant dense<0.000000e+00> : vector<16x16xf32>
    %354 = tpu.matmul %6, %353, %cst_105 {dimension_numbers = #tpu.dot_dimension_numbers<[1], [1], [0], [0], [0, 0, 1, 0], [], []>} : vector<16x128xf32>, vector<16x128xf32>, vector<16x16xf32> -> vector<16x16xf32>
    %cst_106 = arith.constant dense<0.000000e+00> : vector<16x16xf32>
    %355 = tpu.matmul %353, %6, %cst_106 {dimension_numbers = #tpu.dot_dimension_numbers<[1], [1], [0], [0], [0, 0, 1, 0], [], []>} : vector<16x128xf32>, vector<16x128xf32>, vector<16x16xf32> -> vector<16x16xf32>
    %356 = arith.cmpf ogt, %354, %355 : vector<16x16xf32>
    %357 = arith.cmpf oeq, %354, %355 : vector<16x16xf32>
    %358 = arith.cmpi slt, %5, %4 : vector<16x16xi32>
    %359 = arith.andi %357, %358 : vector<16x16xi1>
    %360 = arith.ori %356, %359 : vector<16x16xi1>
    %361 = arith.extui %360 : vector<16x16xi1> to vector<16x16xi32>
    %362 = arith.sitofp %361 : vector<16x16xi32> to vector<16x16xf32>
    %cst_107 = arith.constant dense<0.000000e+00> : vector<16xf32>
    %363 = vector.multi_reduction <add>, %362, %cst_107 [1] : vector<16x16xf32> to vector<16xf32>
    %364 = vector.shape_cast %363 : vector<16xf32> to vector<16x1xf32>
    %cst_108 = arith.constant 1.000000e+00 : f32
    %365 = vector.broadcast %cst_108 : f32 to vector<16x1xf32>
    %366 = arith.cmpf olt, %364, %365 : vector<16x1xf32>
    %cst_109 = arith.constant 0.000000e+00 : f32
    %367 = vector.broadcast %cst_109 : f32 to vector<16x128xf32>
    %368 = arith.cmpf ogt, %280, %367 : vector<16x128xf32>
    %369 = vector.broadcast %366 : vector<16x1xi1> to vector<16x128xi1>
    %370 = arith.andi %369, %368 : vector<16x128xi1>
    %371 = arith.extui %370 : vector<16x128xi1> to vector<16x128xi32>
    %372 = arith.sitofp %371 : vector<16x128xi32> to vector<16x128xf32>
    %373 = vector.extract_strided_slice %355 {offsets = [0, 0], sizes = [16, 1], strides = [1, 1]} : vector<16x16xf32> to vector<16x1xf32>
    %374 = vector.broadcast %297 : vector<1x1xf32> to vector<16x1xf32>
    %375 = arith.addf %373, %374 : vector<16x1xf32>
    %376 = math.tanh %375 : vector<16x1xf32>
    %377 = vector.broadcast %376 : vector<16x1xf32> to vector<16x128xf32>
    %378 = arith.mulf %342, %377 : vector<16x128xf32>
    %379 = arith.mulf %378, %372 : vector<16x128xf32>
    %cst_110 = arith.constant dense<0.000000e+00> : vector<128xf32>
    %380 = vector.multi_reduction <add>, %379, %cst_110 [0] : vector<16x128xf32> to vector<128xf32>
    %381 = vector.shape_cast %380 : vector<128xf32> to vector<1x128xf32>
    %cst_111 = arith.constant 1.000000e+00 : f32
    %382 = vector.broadcast %cst_111 : f32 to vector<1x128xf32>
    %383 = arith.mulf %381, %382 : vector<1x128xf32>
    %384 = vector.shape_cast %383 : vector<1x128xf32> to vector<1x128xf32>
    %385 = vector.broadcast %384 : vector<1x128xf32> to vector<8x128xf32>
    %c0_112 = arith.constant 0 : index
    %c0_113 = arith.constant 0 : index
    %c0_114 = arith.constant 0 : index
    %386 = vector.load %arg6[%c0_112, %c0_113, %c0_114] : memref<1x8x128xf32, #tpu.memory_space<vmem>>, vector<1x8x128xf32>
    %387 = vector.shape_cast %386 : vector<1x8x128xf32> to vector<8x128xf32>
    %388 = vector.shape_cast %385 : vector<8x128xf32> to vector<1x8x128xf32>
    tpu.vector_store %arg6[%c0_112, %c0_113, %c0_114], %388 {strides = array<i32>} : memref<1x8x128xf32, #tpu.memory_space<vmem>>, vector<1x8x128xf32>,
    return
  }
  func.func @transform_0(%arg0: i32) -> (i32, i32, i32) {
    %c0_i32 = arith.constant 0 : i32
    %c0_i32_0 = arith.constant 0 : i32
    %c0_i32_1 = arith.constant 0 : i32
    return %arg0, %c0_i32, %c0_i32_0 : i32, i32, i32
  }
  func.func @transform_1(%arg0: i32) -> (i32, i32, i32) {
    %c0_i32 = arith.constant 0 : i32
    %c0_i32_0 = arith.constant 0 : i32
    %c0_i32_1 = arith.constant 0 : i32
    return %arg0, %c0_i32, %c0_i32_0 : i32, i32, i32
  }
  func.func @transform_2(%arg0: i32) -> (i32, i32, i32) {
    %c0_i32 = arith.constant 0 : i32
    %c0_i32_0 = arith.constant 0 : i32
    %c0_i32_1 = arith.constant 0 : i32
    %c0_i32_2 = arith.constant 0 : i32
    return %c0_i32, %c0_i32_0, %c0_i32_1 : i32, i32, i32
  }
  func.func @transform_3(%arg0: i32) -> (i32, i32, i32) {
    %c0_i32 = arith.constant 0 : i32
    %c0_i32_0 = arith.constant 0 : i32
    %c0_i32_1 = arith.constant 0 : i32
    %c0_i32_2 = arith.constant 0 : i32
    return %c0_i32, %c0_i32_0, %c0_i32_1 : i32, i32, i32
  }
  func.func @transform_4(%arg0: i32) -> (i32, i32, i32) {
    %c0_i32 = arith.constant 0 : i32
    %c0_i32_0 = arith.constant 0 : i32
    %c0_i32_1 = arith.constant 0 : i32
    %c0_i32_2 = arith.constant 0 : i32
    return %c0_i32, %c0_i32_0, %c0_i32_1 : i32, i32, i32
  }
  func.func @transform_5(%arg0: i32) -> (i32, i32, i32) {
    %c0_i32 = arith.constant 0 : i32
    %c0_i32_0 = arith.constant 0 : i32
    %c0_i32_1 = arith.constant 0 : i32
    return %arg0, %c0_i32, %c0_i32_0 : i32, i32, i32
  }
}

</mosaic_0001>

<bundles_post_ra>
// kernel: tpu_custom_call.1
= control target key start
LH: loop header
LB: loop body
LE: loop exit
PB: predicated region body
PF: predicated region fallthrough
CT: control target
= control target key end

     0   :  { %s4715_s0 = inlined_call_operand.hbm [shape: f32[2,16,16], index: 0, kind: input, shape index: {}]   ;;  %s4716_s1 = inlined_call_operand.hbm [shape: f32[2,16,128], index: 1, kind: input, shape index: {}]   ;;  %s4717_s2 = inlined_call_operand.hbm [shape: f32[4,128,128], index: 2, kind: input, shape index: {}]   ;;  %s4718_s3 = inlined_call_operand.hbm [shape: f32[4,8,128], index: 3, kind: input, shape index: {}]   ;;  %s4719_s4 = inlined_call_operand.hbm [shape: f32[4,8,128], index: 4, kind: input, shape index: {}]   ;;  %s4720_s5 = inlined_call_operand.hbm [shape: f32[2,8,128], index: 5, kind: output, shape index: {}]  }
   0x1   :  { %4728 = sst [smem:[#allocation17_spill]] %s4715_s0 }
   0x2   :  { %4729 = sst [smem:[#allocation18_spill]] %s4717_s2 }
   0x3   :  { %4730 = sst [smem:[#allocation19_spill]] %s4718_s3 }
   0x4   :  { %4731 = sst [smem:[#allocation20_spill]] %s4719_s4 }
   0x5   :  { %10 = vsyncpa [#allocation3], 0 }
   0x6   :  { %12 = vsyncpa [#allocation3 + $0x1], 0 }
   0x7   :  { %13 = vsyncpa [#allocation6], 0 }
   0x8   :  { %15 = vsyncpa [#allocation6 + $0x1], 0 }
   0x9   :  { %16 = vsyncpa [#allocation9], 0 }
   0xa   :  { %17 = vsyncpa [#allocation4], 0 }
   0xb   :  { %19 = vsyncpa [#allocation4 + $0x1], 0  ;;  %s4089_s18 = smov 0   ;;  %s4091_s19 = smov 0  }
   0xc   :  { %s4093_s20 = smov 0   ;;  %s4095_s21 = smov 0  }
   0xd LB: > { %s4110_s22 = sadd.s32 4294967295, %s4045_s21   ;;  %s2990_s23 = sadd.s32 4294967294, %s4045_s21   ;;  %s4045_s21 = sphi %s4095_s21, %s4761_s21   ;;  %s4041_s20 = sphi %s4093_s20, %s4760_s20   ;;  %s4037_s19 = sphi %s4091_s19, %s4759_s19   ;;  %s4033_s18 = sphi %s4089_s18, %s4758_s18  }
   0xe   : > { %p45_p0 = scmp.ne.s32.totalorder %s4037_s19, %s4033_s18  ;;  %p4721_p1 = scmp.eq.s32.totalorder %s4110_s22, 0 }
   0xf   : > { %p164_p3 = scmp.eq.s32.totalorder %s2990_s23, 1  ;;  %p2991_p5 = scmp.ge.s32.totalorder %s4045_s21, 1 }
  0x10   : > { %p4119_p4 = por %p4721_p1, %p45_p0  ;;  %p171_p7 = scmp.lt.s32.totalorder %s4045_s21, 3 }
  0x11   : > { %p4124_p6 = por %p164_p3, %p45_p0  ;;  %s4047_s27 = smov [#allocation7]  }
  0x12   : > { %s4732_s24 = scalar_select %p4119_p4, 1, 0 }
  0x13   : > { %s4733_s25 = scalar_select %p4124_p6, 1, 0 }
  0x14   : > { %p4129_p8 = pnand %p2991_p5, %p171_p7  ;;  %s183_s28 = sshll.u32 %s4047_s27, 4  ;;  %s4133_s28 = int_to_ptr.vmem [resolvable:$true] %s183_s28 }
  0x15   : > { %s4048_s30 = smov [#allocation8]   ;;  %s4049_s7 = smov [#allocation10]  }
  0x16   : > { %s4734_s26 = scalar_select %p4129_p8, 1, 0 }
  0x17   : > { %p3709_p9 = pneg %p4129_p8  ;;  %s196_s6 = sshll.u32 %s4048_s30, 4  ;;  %s4144_s6 = int_to_ptr.vmem [resolvable:$true] %s196_s6 }
  0x18   : > { %s4146_s8 = sshll.u32 %s4049_s7, 4  ;;  %s4736_s2 = sld [smem:[#allocation18_spill]]  ;;  %s210_s8 = int_to_ptr.vmem [resolvable:$true] %s4146_s8 }
  0x19   : > { %p4140_p11 = pnand %p3709_p9, %p4721_p1 }
  0x1b   : > { %p4156_p13 = pneg %p4140_p11 }
  0x1e   : > { %s3823_s11 = scalar_lea.hbm %s4736_s2, 8192 }
  0x1f   : > { %p3824_p12 = scmp.ne.s32.totalorder %s4736_s2, %s3823_s11  ;;  %p3830_p5 = scmp.lt.u32.totalorder %s3823_s11, %s4736_s2 }
  0x21   : > { %p3826_p0 = pnand %p4156_p13, %p3824_p12 }
  0x23   : > { %p3827_p3 = pneg %p3826_p0 }
  0x25   : > { %p3832_p7 = pnand %p3830_p5, %p3827_p3 }
  0x27   : > { %3835 = shalt.err (!%p3832_p7)
}
  0x28   : > { %s3836_s17 = scalar_lea.vmem %s4133_s28, 8192  ;;  %p3844_p2 = scmp.lt.s32.totalorder %s4133_s28, %s4133_s28 }
  0x29   : > { %p3837_p9 = scmp.ne.s32.totalorder %s4133_s28, %s3836_s17  ;;  %p3845_p6 = scmp.lt.s32.totalorder %s3836_s17, %s3836_s17 }
  0x2b   : > { %p3839_p10 = pnand %p3837_p9, %p4156_p13  ;;  %p3846_p12 = por %p3845_p6, %p3844_p2 }
  0x2d   : > { %p3840_p1 = pneg %p3839_p10 }
  0x2f   : > { %p3847_p0 = pnand %p3846_p12, %p3840_p1 }
  0x31   : > { %3850 = shalt.err (!%p3847_p0)
}
  0x32   : > { %s4724_s23 = smov 128   ;;  %s4726_s27 = smov 8  }
  0x33   : > { %3712 = dma.hbm_to_vmem [thread:$0]  (!%p4140_p11), %s4736_s2, 8192, %s4133_s28, [#allocation6], %s4724_s23, %s4724_s23, %s4726_s27  }
  0x34   : > { %s4738_s3 = sld [smem:[#allocation19_spill]] }
  0x3a   : > { %s3851_s11 = scalar_lea.hbm %s4738_s3, 512 }
  0x3b   : > { %p3852_p1 = scmp.ne.s32.totalorder %s4738_s3, %s3851_s11  ;;  %p3858_p10 = scmp.lt.u32.totalorder %s3851_s11, %s4738_s3 }
  0x3d   : > { %p3854_p2 = pnand %p3852_p1, %p4156_p13 }
  0x3f   : > { %p3855_p6 = pneg %p3854_p2 }
  0x41   : > { %p3860_p3 = pnand %p3858_p10, %p3855_p6 }
  0x43   : > { %3863 = shalt.err (!%p3860_p3)
}
  0x44   : > { %s3864_s28 = scalar_lea.vmem %s4144_s6, 512  ;;  %p3872_p12 = scmp.lt.s32.totalorder %s4144_s6, %s4144_s6 }
  0x45   : > { %p3865_p5 = scmp.ne.s32.totalorder %s4144_s6, %s3864_s28  ;;  %p3873_p0 = scmp.lt.s32.totalorder %s3864_s28, %s3864_s28 }
  0x47   : > { %p3867_p7 = pnand %p3865_p5, %p4156_p13  ;;  %p3874_p1 = por %p3873_p0, %p3872_p12 }
  0x49   : > { %p3868_p9 = pneg %p3867_p7 }
  0x4b   : > { %p3875_p2 = pnand %p3874_p1, %p3868_p9 }
  0x4d   : > { %3878 = shalt.err (!%p3875_p2)
}
  0x4e   : > { %3715 = dma.hbm_to_vmem [thread:$0]  (!%p4140_p11), %s4738_s3, 512, %s4144_s6, [#allocation9], %s4724_s23, %s4724_s23, %s4726_s27  }
  0x4f   : > { %s4739_s4 = sld [smem:[#allocation20_spill]] }
  0x55   : > { %s3879_s10 = scalar_lea.hbm %s4739_s4, 512 }
  0x56   : > { %p3880_p6 = scmp.ne.s32.totalorder %s4739_s4, %s3879_s10  ;;  %p3886_p5 = scmp.lt.u32.totalorder %s3879_s10, %s4739_s4 }
  0x58   : > { %p3882_p10 = pnand %p3880_p6, %p4156_p13 }
  0x5a   : > { %p3883_p3 = pneg %p3882_p10 }
  0x5c   : > { %p3888_p7 = pnand %p3886_p5, %p3883_p3 }
  0x5e   : > { %3891 = shalt.err (!%p3888_p7)
}
  0x5f   : > { %s3892_s16 = scalar_lea.vmem %s210_s8, 512  ;;  %p3900_p1 = scmp.lt.s32.totalorder %s210_s8, %s210_s8 }
  0x60   : > { %p3893_p9 = scmp.ne.s32.totalorder %s210_s8, %s3892_s16  ;;  %p3901_p2 = scmp.lt.s32.totalorder %s3892_s16, %s3892_s16 }
  0x62   : > { %p3895_p12 = pnand %p3893_p9, %p4156_p13  ;;  %p3902_p4 = por %p3901_p2, %p3900_p1 }
  0x64   : > { %p3896_p0 = pneg %p3895_p12 }
  0x66   : > { %p3903_p8 = pnand %p3902_p4, %p3896_p0 }
  0x68   : > { %3906 = shalt.err (!%p3903_p8)
}
  0x69   : > { %3718 = dma.hbm_to_vmem [thread:$0]  (!%p4140_p11), %s4739_s4, 512, %s210_s8, [#allocation9], %s4724_s23, %s4724_s23, %s4726_s27  }
  0x6a   : > { %s4229_s14 = sadd.s32 1, %s4045_s21   ;;  %s32_s17 = sadd.s32 1, %s4041_s20 }
  0x6b   : > { %s29_s29 = ssub.s32 %s4045_s21, %s4229_s14  ;;  %p39_p8 = scmp.ne.s32.totalorder %s4041_s20, %s4037_s19 }
  0x6c   : > { %p30_p4 = scmp.eq.s32.totalorder %s29_s29, 0  ;;  %p40_p13 = scmp.eq.s32.totalorder %s4045_s21, 0 }
  0x6d   : > { %p3733_p6 = scmp.lt.s32.totalorder %s4045_s21, 2  ;;  %p4740_p3 = scmp.eq.s32.totalorder %s4110_s22, 1 }
  0x6e   : > { %s4239_s30 = scalar_select %p30_p4, %s4041_s20, %s32_s17  }
  0x6f   : > { %p41_p10 = por %p40_p13, %p39_p8  ;;  %p4243_p5 = por %p4740_p3, %p39_p8 }
  0x70   : > { %s223_s9 = sand.u32 1, %s4041_s20   ;;  %s3059_s10 = sshll.u32 %s4045_s21, 8 }
  0x71   : > { %s4249_s8 = sshll.u32 %s223_s9, 4  ;;  %s4742_s0 = sld [smem:[#allocation17_spill]] }
  0x72   : > { %s227_s15 = scalar_lea.vmem [#allocation2], %s4249_s8  ;;  %p4257_p11 = pnand %p3733_p6, %p41_p10 }
  0x73   : > { %s234_s16 = sshll.u32 %s227_s15, 4  ;;  %s4266_s17 = scalar_lea.hbm %s4716_s1, %s3059_s10  ;;  %s4261_s16 = int_to_ptr.vmem [resolvable:$true] %s234_s16 }
  0x74   : > { %s4268_s11 = scalar_lea.sflag [#allocation3], %s223_s9  ;;  %p3909_p9 = pneg %p4257_p11 }
  0x77   : > { %s4254_s13 = scalar_lea.hbm %s4742_s0, %s3059_s10  ;;  %s3912_s27 = scalar_lea.hbm %s4742_s0, 512 }
  0x78   : > { %s3907_s12 = scalar_lea.hbm %s4254_s13, 256  ;;  %p3913_p1 = scmp.lt.u32.totalorder %s4254_s13, %s4742_s0 }
  0x79   : > { %p3908_p7 = scmp.ne.s32.totalorder %s4254_s13, %s3907_s12  ;;  %p3914_p2 = scmp.lt.u32.totalorder %s3912_s27, %s3907_s12 }
  0x7a   : > { %p3916_p8 = scmp.lt.u32.totalorder %s3907_s12, %s4254_s13 }
  0x7b   : > { %p3910_p12 = pnand %p3909_p9, %p3908_p7  ;;  %p3915_p4 = por %p3914_p2, %p3913_p1 }
  0x7d   : > { %p3911_p0 = pneg %p3910_p12  ;;  %p3917_p13 = por %p3916_p8, %p3915_p4 }
  0x7f   : > { %p3918_p6 = pnand %p3917_p13, %p3911_p0 }
  0x81   : > { %3921 = shalt.err (!%p3918_p6)
}
  0x82   : > { %s3922_s9 = scalar_lea.vmem %s4261_s16, 256  ;;  %s4052_s23 = smov [#allocation2]  }
  0x83   : > { %p3923_p10 = scmp.ne.s32.totalorder %s4261_s16, %s3922_s9  ;;  %s3927_s10 = sshll.u32 %s4052_s23, 4  ;;  %s3928_s10 = int_to_ptr.vmem [resolvable:$false] %s3927_s10 }
  0x84   : > { %s3929_s2 = scalar_lea.vmem %s3928_s10, 512  ;;  %p3930_p12 = scmp.lt.s32.totalorder %s4261_s16, %s3928_s10 }
  0x85   : > { %p3925_p3 = pnand %p3923_p10, %p3909_p9  ;;  %p3931_p1 = scmp.lt.s32.totalorder %s3929_s2, %s3922_s9 }
  0x87   : > { %p3926_p7 = pneg %p3925_p3  ;;  %p3932_p2 = por %p3931_p1, %p3930_p12 }
  0x89   : > { %p3933_p4 = pnand %p3932_p2, %p3926_p7 }
  0x8b   : > { %3936 = shalt.err (!%p3933_p4)
}
  0x8c   : > { %s4744_s3 = smov 8   ;;  %s4745_s27 = smov 128  }
  0x8d   : > { %3722 = dma.hbm_to_vmem [thread:$0]  (!%p4257_p11), %s4254_s13, 256, %s4261_s16, %s4268_s11, %s4745_s27, %s4745_s27, %s4744_s3  }
  0x8e   : > { %s248_s28 = scalar_lea.vmem [#allocation5], %s4249_s8  ;;  %s244_s12 = sand.u32 1, %s4045_s21  }
  0x8f   : > { %s255_s29 = sshll.u32 %s248_s28, 4  ;;  %s4303_s15 = scalar_lea.sflag [#allocation6], %s244_s12  ;;  %s4301_s29 = int_to_ptr.vmem [resolvable:$true] %s255_s29 }
  0x90   : > { %s3937_s9 = scalar_lea.hbm %s4266_s17, 256  ;;  %s3942_s2 = scalar_lea.hbm %s4716_s1, 512 }
  0x91   : > { %p3938_p0 = scmp.ne.s32.totalorder %s4266_s17, %s3937_s9  ;;  %p3943_p6 = scmp.lt.u32.totalorder %s4266_s17, %s4716_s1 }
  0x92   : > { %p3944_p10 = scmp.lt.u32.totalorder %s3942_s2, %s3937_s9  ;;  %p3946_p7 = scmp.lt.u32.totalorder %s3937_s9, %s4266_s17 }
  0x93   : > { %p3940_p8 = pnand %p3938_p0, %p3909_p9 }
  0x94   : > { %p3945_p3 = por %p3944_p10, %p3943_p6 }
  0x95   : > { %p3941_p13 = pneg %p3940_p8 }
  0x96   : > { %p3947_p12 = por %p3946_p7, %p3945_p3 }
  0x98   : > { %p3948_p1 = pnand %p3947_p12, %p3941_p13 }
  0x9a   : > { %3951 = shalt.err (!%p3948_p1)
}
  0x9b   : > { %s3952_s8 = scalar_lea.vmem %s4301_s29, 256  ;;  %s4053_s13 = smov [#allocation5]  }
  0x9c   : > { %p3953_p2 = scmp.ne.s32.totalorder %s4301_s29, %s3952_s8  ;;  %s3957_s16 = sshll.u32 %s4053_s13, 4  ;;  %s3958_s16 = int_to_ptr.vmem [resolvable:$false] %s3957_s16 }
  0x9d   : > { %s3959_s0 = scalar_lea.vmem %s3958_s16, 512  ;;  %p3960_p8 = scmp.lt.s32.totalorder %s4301_s29, %s3958_s16 }
  0x9e   : > { %p3955_p4 = pnand %p3953_p2, %p3909_p9  ;;  %p3961_p6 = scmp.lt.s32.totalorder %s3959_s0, %s3952_s8 }
  0xa0   : > { %p3956_p0 = pneg %p3955_p4  ;;  %p3962_p10 = por %p3961_p6, %p3960_p8 }
  0xa2   : > { %p3963_p3 = pnand %p3962_p10, %p3956_p0 }
  0xa4   : > { %3966 = shalt.err (!%p3963_p3)
}
  0xa5   : > { %3725 = dma.hbm_to_vmem [thread:$0]  (!%p4257_p11), %s4266_s17, 256, %s4301_s29, %s4303_s15, %s4745_s27, %s4745_s27, %s4744_s3  }
  0xa6   : > { %p4746_p9 = scmp.ne.s32.totalorder %s4734_s26, 0 }
  0xa7   : > { %s4335_s4 = sand.u32 (!%p4746_p9), 1, %s4037_s19   ;;  %p4747_p13 = scmp.ne.s32.totalorder (!%p4746_p9), %s4732_s24, 0 }
  0xa8   : > { %267 = sbr.rel (%p4746_p9) target bundleno = 5236 (0x1474), region = 40  ;;  %s3003_s11 = sshll.u32 (!%p4746_p9), %s4335_s4, 4 }
  0xa9   : > { %s270_s28 = scalar_lea.sflag (!%p4746_p9), [#allocation3], %s4335_s4  ;;  %s4339_s12 = scalar_lea.vmem (!%p4746_p9), [#allocation2], %s3003_s11 }
  0xaf   : > { %4012 = dma.done.wait (%p4747_p13), %s270_s28, 256  }
  0xb0   : > { %4014 = vsyncadd (%p4747_p13), %s270_s28, 4294967040  ;;  %s278_s6 = sand.u32 1, %s4110_s22   ;;  %s4346_s17 = scalar_lea.vmem [#allocation5], %s3003_s11 }
  0xb1   : > { %s279_s26 = scalar_lea.sflag [#allocation6], %s278_s6 }
  0xb2   : > { %4016 = dma.done.wait (%p4747_p13), %s279_s26, 256  }
  0xb3   : > { %4018 = vsyncadd (%p4747_p13), %s279_s26, 4294967040  ;;  %p4748_p11 = scmp.eq.s32.totalorder %s4110_s22, 0 }
  0xb5   : > { %4020 = dma.done.wait (%p4748_p11), [#allocation6], 8192   ;;  %p4749_p7 = pmov %p4748_p11 }
  0xb7   : > { %4022 = vsyncadd (%p4749_p7), [#allocation6], 4294959104  ;;  %p4750_p12 = pmov %p4749_p7 }
  0xb8   : > { %p4751_p1 = pmov %p4749_p7 }
  0xb9   : > { %4024 = dma.done.wait (%p4750_p12), [#allocation9], 1024  }
  0xba   : > { %4026 = vsyncadd (%p4751_p1), [#allocation9], 4294966272  ;;  %v4054_v0 = vmov 1.0|1.0   ;;  %vm343_vm0 = vcmask 130048   ;;  %v4363_v1 = vld [vmem:[%s4339_s12] sm:$0xff]  ;;  %v330_v45 = vlaneseq }
  0xbb   : > { %3493 = vmatprep.subr.bf16.mxu1 %v4054_v0  ;;  %v4366_v2 = vld [vmem:[%s4339_s12 + $0x8] sm:$0xff]  ;;  %v429_v3 = vld [vmem:[#allocation7] sm:$0xff]  ;;  %3217 = vmatprep.mubr.msk.f32.mxu1 %vm343_vm0, %v4363_v1  ;;  %v431_v5 = vld [vmem:[#allocation7 + $0x10] sm:$0xff]  ;;  %v4055_v29 = vmov 0   ;;  %s3008_s24 = sshll.u32 %s4335_s4, 3  ;;  %s3056_s3 = sshll.u32 %s4110_s22, 7 }
  0xbc   : > { %3494 = vmatpush3.bf16.msra.mxu1 %v4054_v0  ;;  %v430_v4 = vld [vmem:[#allocation7 + $0x8] sm:$0xff]  ;;  %v432_v6 = vld [vmem:[#allocation7 + $0x18] sm:$0xff]  ;;  %3259 = vmatprep.mubr.msk.f32.mxu0 %vm343_vm0, %v4363_v1  ;;  %v433_v9 = vld [vmem:[#allocation7 + $0x20] sm:$0xff]  ;;  %v4383_v47 = vshrl.u32 %v330_v45, 7  ;;  %s325_s27 = scalar_lea.vmem [#allocation11], %s3008_s24  ;;  %s4671_s23 = scalar_lea.hbm %s4720_s5, %s3056_s3 }
  0xbd   : > { %v3495_v7 = vpack.c.bf16 %v430_v4, %v429_v3  ;;  %v3499_v8 = vpack.c.bf16 %v432_v6, %v431_v5  ;;  %v434_v10 = vld [vmem:[#allocation7 + $0x28] sm:$0xff]  ;;  %v328_v12 = vld [vmem:[%s4346_s17] sm:$0xff]  ;;  %v436_v14 = vld [vmem:[#allocation7 + $0x38] sm:$0xff]  ;;  %3779 = vset.pattern.permute.xlu0 %v4055_v29  ;;  %3780 = vset.pattern.permute.xlu1 %v4055_v29  ;;  %s2869_s29 = sshll.u32 %s325_s27, 4  ;;  %s2856_s10 = scalar_lea.sflag [#allocation4], %s4335_s4  ;;  %s4673_s29 = int_to_ptr.vmem [resolvable:$true] %s2869_s29 }
  0xbe   : > { %v3503_v11 = vpack.c.bf16 %v434_v10, %v433_v9  ;;  %v435_v13 = vld [vmem:[#allocation7 + $0x30] sm:$0xff]  ;;  %v437_v16 = vld [vmem:[#allocation7 + $0x40] sm:$0xff]  ;;  %v438_v17 = vld [vmem:[#allocation7 + $0x48] sm:$0xff]  ;;  %v4386_v48 = vsub.s32 0, %v4383_v47  ;;  %s3967_s2 = scalar_lea.vmem %s4673_s29, 128  ;;  %s4058_s22 = smov [#allocation11]  }
  0xbf   : > { %3218 = vmatmul.mubr.msk.f32.vlgmr.msra.gmra.mrb[0].mxu1 %vm343_vm0, %v4366_v2  ;;  %3496 = vmatprep.subr.bf16.mxu1 %v3495_v7  ;;  %v3507_v15 = vpack.c.bf16 %v436_v14, %v435_v13  ;;  %v3511_v18 = vpack.c.bf16 %v438_v17, %v437_v16  ;;  %v439_v19 = vld [vmem:[#allocation7 + $0x50] sm:$0xff]  ;;  %v440_v20 = vld [vmem:[#allocation7 + $0x58] sm:$0xff]  ;;  %v441_v22 = vld [vmem:[#allocation7 + $0x60] sm:$0xff]  ;;  %p3968_p2 = scmp.ne.s32.totalorder %s4673_s29, %s3967_s2  ;;  %s3971_s8 = sshll.u32 %s4058_s22, 4  ;;  %s3972_s8 = int_to_ptr.vmem [resolvable:$false] %s3971_s8 }
  0xc0   : > { %3498 = vmatpush3.bf16.msra.mxu1 %v3495_v7  ;;  %3252 = vmatprep.mubr.f32.mxu1 %v328_v12  ;;  %v3515_v21 = vpack.c.bf16 %v440_v20, %v439_v19  ;;  %v442_v23 = vld [vmem:[#allocation7 + $0x68] sm:$0xff]  ;;  %v443_v25 = vld [vmem:[#allocation7 + $0x70] sm:$0xff]  ;;  %v444_v26 = vld [vmem:[#allocation7 + $0x78] sm:$0xff]  ;;  %s3973_s13 = scalar_lea.vmem %s3972_s8, 256  ;;  %p3974_p8 = scmp.lt.s32.totalorder %s4673_s29, %s3972_s8 }
  0xc1   : > { %3500 = vmatprep.subr.bf16.mxu1 %v3499_v8  ;;  %v3519_v24 = vpack.c.bf16 %v442_v23, %v441_v22  ;;  %v3523_v27 = vpack.c.bf16 %v444_v26, %v443_v25  ;;  %v329_v28 = vld [vmem:[%s4346_s17 + $0x8] sm:$0xff]  ;;  %v341_v50 = vld [vmem:[#allocation8] sm:$0xff]  ;;  %v4393_v25 = vsub.s32 2, %v4383_v47  ;;  %p3969_p4 = pnand %p3968_p2, %p4243_p5  ;;  %p3975_p6 = scmp.lt.s32.totalorder %s3973_s13, %s3967_s2 }
  0xc2   : > { %v628_v54 = vrot.slane %v341_v50, %v4386_v48 }
  0xc3   : > { %p3970_p0 = pneg %p3969_p4  ;;  %p3976_p10 = por %p3975_p6, %p3974_p8 }
  0xc4   : > { %3502 = vmatpush3.bf16.msra.mxu1 %v3499_v8 }
  0xc5   : > { %3504 = vmatprep.subr.bf16.mxu1 %v3503_v11  ;;  %p3977_p3 = pnand %p3976_p10, %p3970_p0 }
  0xc8   : > { %3506 = vmatpush3.bf16.msra.mxu1 %v3503_v11 }
  0xc9   : > { %3508 = vmatprep.subr.bf16.mxu1 %v3507_v15 }
  0xcc   : > { %3510 = vmatpush3.bf16.msra.mxu1 %v3507_v15 }
  0xcd   : > { %3512 = vmatprep.subr.bf16.mxu1 %v3511_v18 }
  0xd0   : > { %3514 = vmatpush3.bf16.msra.mxu1 %v3511_v18 }
  0xd1   : > { %3516 = vmatprep.subr.bf16.mxu1 %v3515_v21 }
  0xd4   : > { %3518 = vmatpush3.bf16.msra.mxu1 %v3515_v21 }
  0xd5   : > { %3520 = vmatprep.subr.bf16.mxu1 %v3519_v24 }
  0xd8   : > { %3522 = vmatpush3.bf16.msra.mxu1 %v3519_v24  ;;  %v4390_v24 = vsub.s32 1, %v4383_v47 }
  0xd9   : > { %3524 = vmatprep.subr.bf16.mxu1 %v3523_v27 }
  0xda   : > { %v664_v26 = vrot.slane %v341_v50, %v4390_v24 }
  0xdc   : > { %3526 = vmatpush3.bf16.msra.mxu1 %v3523_v27 }
  0xdf   : > { %3253 = vmatmul.mubr.f32.vlgmr.msra.gmra.mrb[2].mxu1 %v329_v28 }
  0xe0   : > { %3329 = vmatprep.mubr.msk.f32.mxu1 %vm343_vm0, %v4363_v1 }
 0x192   : > { %v3219_v30 = vpop.f32.mrb[0].mxu1 }
 0x193   : > { %v416_v31 = vpop.f32.mrb[1].mxu1  ;;  %v426_v32 = vadd.f32 1.0, %v3219_v30  ;;  %v670_v30 = vrot.slane %v341_v50, %v4393_v25 }
 0x194   : > { %v425_v33 = vadd.f32 1.0, %v416_v31 }
 0x196   : > { %3781 = vrsqrt.f32 %v425_v33 }
 0x197   : > { %3783 = vrsqrt.f32 %v426_v32 }
 0x1a0   : > { %v3782_v34 = vpop.eup %3781 }
 0x1a1   : > { %522 = vperm.xlu0 %3779, %v3782_v34   ;;  %v609_v35 = vmul.f32 %v3782_v34, %v3782_v34  ;;  %v3784_v36 = vpop.eup %3783 }
 0x1a2   : > { %v610_v37 = vmul.f32 %v3784_v36, %v3784_v36 }
 0x1a3   : > { %613 = vperm.xlu1 %3780, %v609_v35  }
 0x1a5   : > { %527 = vperm.xlu0 %3779, %v3784_v36   ;;  %v4056_v36 = vmov 1.0  }
 0x1a7   : > { %618 = vperm.xlu1 %3780, %v610_v37   ;;  %v342_v37 = vld [vmem:[#allocation10] sm:$0xff] }
 0x1b2   : > { %v3254_v38 = vpop.f32.mrb[2].mxu1 }
 0x1b3   : > { %v511_v39 = vpop.f32.mrb[3].mxu1 }
 0x220   : > { %v523_v40 = vpop.permute.xlu0 %522 }
 0x221   : > { %v530_v42 = vmul.f32 %v523_v40, %v511_v39 }
 0x222   : > { %v614_v46 = vpop.permute.xlu1 %613 }
 0x223   : > { %v621_v56 = vmul.f32 %v614_v46, %v511_v39  ;;  %v759_v39 = vrot.slane %v342_v37, %v4390_v24 }
 0x224   : > { %v528_v41 = vpop.permute.xlu0 %527 }
 0x225   : > { %v531_v43 = vmul.f32 %v3254_v38, %v528_v41 }
 0x226   : > { %v619_v49 = vpop.permute.xlu1 %618 }
 0x227   : > { %v3527_v44 = vpack.c.bf16 %v531_v43, %v530_v42  ;;  %v622_v52 = vmul.f32 %v3254_v38, %v619_v49  ;;  %v753_v38 = vrot.slane %v342_v37, %v4386_v48 }
 0x229   : > { %3528 = vmatprep.subr.bf16.mxu0 %v3527_v44 }
 0x22a   : > { %3530 = vmatpush3.bf16.msra.mxu0 %v3527_v44 }
 0x22d   : > { %3260 = vmatmul.mubr.msk.f32.vlgmr.msra.gmra.mrb[0].mxu0 %vm343_vm0, %v4366_v2 }
 0x22e   : > { %3266 = vmatprep.mubr.msk.f32.mxu0 %vm343_vm0, %v4363_v1 }
 0x300   : > { %v3261_v51 = vpop.f32.mrb[0].mxu0 }
 0x301   : > { %v608_v53 = vmul.f32 %v3261_v51, %v528_v41  ;;  %v598_v55 = vpop.f32.mrb[1].mxu0 }
 0x302   : > { %v607_v57 = vmul.f32 %v598_v55, %v523_v40  ;;  %v4419_v55 = vand.u32 127, %v330_v45  ;;  %v953_v45 = vrot.slane %v342_v37, %v4393_v25  ;;  %v1070_v37 = vld [vmem:[#allocation7 + $0xf0] sm:$0xff] }
 0x303   : > { %v624_v58 = vadd.f32 %v622_v52, %v608_v53 }
 0x304   : > { %v623_v59 = vadd.f32 %v621_v56, %v607_v57  ;;  %vm922_vm4 = vcmp.lt.s32.totalorder %v4419_v55, %v4383_v47 }
 0x305   : > { %v630_v60 = vadd.f32 %v628_v54, %v624_v58  ;;  %v4057_v58 = vmov 0.0  }
 0x306   : > { %v629_v61 = vadd.f32 %v628_v54, %v623_v59  ;;  %v4416_v54 = vadd.s32 8, %v4383_v47 }
 0x307   : > { %v632_v62 = vmax.f32 %v630_v60, 0.0 }
 0x308   : > { %v631_v63 = vmax.f32 %v629_v61, 0.0  ;;  %vm923_vm1 = vcmp.lt.s32.totalorder %v4419_v55, %v4416_v54 }
 0x30a   : > { %v635_v3 = vadd.f32 %v632_v62, %v631_v63 }
 0x30c   : > { %v636_v4 = vrot.slane %v635_v3, 4 }
 0x30e   : > { %v637_v5 = vadd.f32 %v636_v4, %v635_v3 }
 0x310   : > { %v638_v6 = vrot.slane %v637_v5, 2 }
 0x312   : > { %v639_v7 = vadd.f32 %v638_v6, %v637_v5 }
 0x314   : > { %v640_v8 = vrot.slane %v639_v7, 1 }
 0x316   : > { %v641_v9 = vadd.f32 %v640_v8, %v639_v7  ;;  %v1056_v7 = vld [vmem:[#allocation7 + $0x80] sm:$0xff]  ;;  %v1057_v8 = vld [vmem:[#allocation7 + $0x88] sm:$0xff] }
 0x318   : > { %v642_v10 = vmul.f32 0.0625, %v641_v9 }
 0x31a   : > { %v643_v11 = vsub.f32 %v631_v63, %v642_v10  ;;  %v644_v12 = vsub.f32 %v632_v62, %v642_v10  ;;  %v3545_v10 = vpack.c.bf16 %v1057_v8, %v1056_v7 }
 0x31c   : > { %v647_v13 = vmul.f32 %v643_v11, %v643_v11  ;;  %v648_v14 = vmul.f32 %v644_v12, %v644_v12 }
 0x31e   : > { %v649_v15 = vadd.f32 %v648_v14, %v647_v13  ;;  %v1060_v14 = vld [vmem:[#allocation7 + $0xa0] sm:$0xff] }
 0x320   : > { %v650_v16 = vrot.slane %v649_v15, 4 }
 0x322   : > { %v651_v17 = vadd.f32 %v650_v16, %v649_v15  ;;  %v1061_v15 = vld [vmem:[#allocation7 + $0xa8] sm:$0xff] }
 0x324   : > { %v652_v18 = vrot.slane %v651_v17, 2 }
 0x326   : > { %v653_v19 = vadd.f32 %v652_v18, %v651_v17  ;;  %v3553_v18 = vpack.c.bf16 %v1061_v15, %v1060_v14 }
 0x328   : > { %v654_v20 = vrot.slane %v653_v19, 1 }
 0x32a   : > { %v655_v21 = vadd.f32 %v654_v20, %v653_v19  ;;  %v1062_v20 = vld [vmem:[#allocation7 + $0xb0] sm:$0xff] }
 0x32c   : > { %v656_v22 = vmul.f32 0.0625, %v655_v21  ;;  %v1063_v21 = vld [vmem:[#allocation7 + $0xb8] sm:$0xff] }
 0x32e   : > { %v657_v23 = vadd.f32 1e-05, %v656_v22 }
 0x330   : > { %3785 = vrsqrt.f32 %v657_v23  ;;  %v3557_v23 = vpack.c.bf16 %v1063_v21, %v1062_v20 }
 0x33a   : > { %v3786_v27 = vpop.eup %3785 }
 0x33b   : > { %v659_v28 = vmul.f32 %v3786_v27, %v643_v11  ;;  %v660_v29 = vmul.f32 %v3786_v27, %v644_v12  ;;  %v1058_v11 = vld [vmem:[#allocation7 + $0x90] sm:$0xff]  ;;  %v1059_v12 = vld [vmem:[#allocation7 + $0x98] sm:$0xff]  ;;  %v1065_v27 = vld [vmem:[#allocation7 + $0xc8] sm:$0xff] }
 0x33c   : > { %v3549_v13 = vpack.c.bf16 %v1059_v12, %v1058_v11 }
 0x33d   : > { %v665_v31 = vmul.f32 %v664_v26, %v659_v28  ;;  %v666_v32 = vmul.f32 %v664_v26, %v660_v29  ;;  %v1064_v26 = vld [vmem:[#allocation7 + $0xc0] sm:$0xff]  ;;  %v1066_v29 = vld [vmem:[#allocation7 + $0xd0] sm:$0xff] }
 0x33e   : > { %v3561_v28 = vpack.c.bf16 %v1065_v27, %v1064_v26 }
 0x33f   : > { %v4397_v33 = vadd.f32 %v670_v30, %v665_v31  ;;  %v4399_v34 = vadd.f32 %v670_v30, %v666_v32  ;;  %v1067_v30 = vld [vmem:[#allocation7 + $0xd8] sm:$0xff]  ;;  %v1068_v32 = vld [vmem:[#allocation7 + $0xe0] sm:$0xff] }
 0x340   : > { %v3565_v31 = vpack.c.bf16 %v1067_v30, %v1066_v29 }
 0x341   : > { %v3531_v35 = vpack.c.bf16 %v4399_v34, %v4397_v33  ;;  %v761_v42 = vmul.f32 %v759_v39, %v4399_v34  ;;  %v760_v46 = vmul.f32 %v759_v39, %v4397_v33 }
 0x343   : > { %3532 = vmatprep.subr.bf16.mxu0 %v3531_v35 }
 0x344   : > { %3534 = vmatpush3.bf16.msra.mxu0 %v3531_v35 }
 0x347   : > { %3267 = vmatmul.mubr.msk.f32.vlgmr.msra.gmra.mrb[2].mxu0 %vm343_vm0, %v4366_v2 }
 0x348   : > { %3273 = vmatprep.mubr.f32.mxu0 %v4056_v36 }
 0x41a   : > { %v3268_v40 = vpop.f32.mrb[2].mxu0 }
 0x41b   : > { %v755_v41 = vmul.f32 %v3268_v40, %v753_v38  ;;  %v741_v43 = vpop.f32.mrb[3].mxu0 }
 0x41c   : > { %v754_v44 = vmul.f32 %v753_v38, %v741_v43  ;;  %v1071_v38 = vld [vmem:[#allocation7 + $0xf8] sm:$0xff] }
 0x41d   : > { %v763_v49 = vadd.f32 %v761_v42, %v755_v41  ;;  %v3573_v39 = vpack.c.bf16 %v1071_v38, %v1070_v37 }
 0x41e   : > { %v762_v50 = vadd.f32 %v760_v46, %v754_v44 }
 0x420   : > { %v3535_v51 = vpack.c.bf16 %v763_v49, %v762_v50 }
 0x422   : > { %3536 = vmatprep.subr.bf16.mxu0 %v3535_v51 }
 0x423   : > { %3538 = vmatpush3.bf16.xpose.msra.mxu0 %v3535_v51 }
 0x424   : > { %3539 = vmatprep.subr.bf16.mxu0 %v4054_v0 }
 0x42a   : > { %3274 = vmatmul.mubr.f32.vlgmr.msra.gmra.mrb[4].mxu0 %v4056_v36 }
 0x42b   : > { %3540 = vmatpush3.bf16.xpose.msra.mxu0 %v4054_v0  ;;  %3280 = vmatprep.mubr.f32.mxu0 %v762_v50 }
 0x432   : > { %3281 = vmatmul.mubr.f32.vlgmr.msra.gmra.mrb[6].mxu0 %v763_v49 }
 0x433   : > { %3287 = vmatprep.mubr.msk.f32.mxu0 %vm343_vm0, %v4363_v1 }
 0x4fd   : > { %v3275_v52 = vpop.f32.mrb[4].mxu0 }
 0x4fe   : > { %v834_v53 = vpop.f32.mrb[5].mxu0 }
 0x505   : > { %v3282_v56 = vpop.f32.mrb[6].mxu0 }
 0x506   : > { %vm921_vm2 = vcmp.eq.f32.partialorder %v3275_v52, %v3282_v56  ;;  %v909_v57 = vpop.f32.mrb[7].mxu0  ;;  %vm919_vm3 = vcmp.gt.f32.partialorder %v3275_v52, %v3282_v56  ;;  %v955_v63 = vadd.f32 %v3282_v56, %v953_v45 }
 0x507   : > { %vm920_vm5 = vcmp.eq.f32.partialorder %v834_v53, %v909_v57  ;;  %vm925_vm6 = vmand %vm921_vm2, %vm923_vm1  ;;  %vm918_vm7 = vcmp.gt.f32.partialorder %v834_v53, %v909_v57  ;;  %v954_v3 = vadd.f32 %v953_v45, %v909_v57 }
 0x508   : > { %vm927_vm8 = vmor %vm919_vm3, %vm925_vm6  ;;  %3787 = vtanh.f32 %v955_v63 }
 0x509   : > { %v3016_v59 = vsel %vm927_vm8, 1.0, %v4057_v58  ;;  %vm924_vm9 = vmand %vm920_vm5, %vm922_vm4  ;;  %3789 = vtanh.f32 %v954_v3  ;;  %v973_v3 = vld [vmem:[#allocation8 + $0x8] sm:$0xff] }
 0x50a   : > { %v935_v60 = vsel %vm343_vm0, %v3016_v59, 0.0  ;;  %vm926_vm10 = vmor %vm918_vm7, %vm924_vm9  ;;  %v1255_v8 = vrot.slane %v973_v3, %v4386_v48 }
 0x50b   : > { %936 = vadd.xlane.f32.xlu1 %v935_v60  ;;  %v3015_v61 = vsel %vm926_vm10, 1.0, %v4057_v58 }
 0x50c   : > { %v932_v62 = vsel %vm343_vm0, %v3015_v61, 0.0 }
 0x50d   : > { %933 = vadd.xlane.f32.xlu0 %v932_v62 }
 0x512   : > { %v3788_v4 = vpop.eup %3787 }
 0x513   : > { %v3790_v5 = vpop.eup %3789 }
 0x51c   : > { %965 = vperm.xlu1 %3780, %v3788_v4  }
 0x523   : > { %960 = vperm.xlu0 %3779, %v3790_v5  }
 0x598   : > { %v937_v6 = vpop.xlane.xlu1 %936 }
 0x599   : > { %vm939_vm11 = vcmp.lt.f32.partialorder %v937_v6, 8.0 }
 0x59a   : > { %v934_v9 = vpop.xlane.xlu0 %933  ;;  %v4451_v42 = vsel %vm939_vm11, 1.0, %v4057_v58 }
 0x59b   : > { %vm938_vm12 = vcmp.lt.f32.partialorder %v934_v9, 8.0  ;;  %vm1392_vm14 = vcmp.gt.f32.partialorder %v4451_v42, 0.0 }
 0x59c   : > { %vm3541_vm13 = vmpackc.low %vm939_vm11, %vm938_vm12  ;;  %v4445_v19 = vsel %vm938_vm12, 1.0, %v4057_v58  ;;  %v966_v40 = vpop.permute.xlu1 %965 }
 0x59d   : > { %3542 = vmatprep.subr.msk.bf16.mxu0 %vm3541_vm13, %v4054_v0  ;;  %v969_v41 = vmul.f32 %v966_v40, %v4399_v34  ;;  %vm1391_vm15 = vcmp.gt.f32.partialorder %v4445_v19, 0.0 }
 0x59e   : > { %3544 = vmatpush3.bf16.msk.msra.mxu0 %vm3541_vm13, %v4054_v0 }
 0x59f   : > { %3546 = vmatprep.subr.bf16.mxu0 %v3545_v10  ;;  %v971_v43 = vmul.f32 %v4451_v42, %v969_v41 }
 0x5a1   : > { %3288 = vmatmul.mubr.msk.f32.vlgmr.msra.gmra.mrb[8].mxu0 %vm343_vm0, %v4366_v2 }
 0x5a2   : > { %3548 = vmatpush3.bf16.msra.mxu0 %v3545_v10  ;;  %v961_v16 = vpop.permute.xlu0 %960 }
 0x5a3   : > { %v968_v17 = vmul.f32 %v961_v16, %v4397_v33  ;;  %3550 = vmatprep.subr.bf16.mxu0 %v3549_v13  ;;  %v1069_v33 = vld [vmem:[#allocation7 + $0xe8] sm:$0xff] }
 0x5a4   : > { %v3569_v35 = vpack.c.bf16 %v1069_v33, %v1068_v32 }
 0x5a5   : > { %v970_v22 = vmul.f32 %v4445_v19, %v968_v17 }
 0x5a6   : > { %3552 = vmatpush3.bf16.msra.mxu0 %v3549_v13 }
 0x5a7   : > { %3322 = vmatprep.mubr.f32.mxu0 %v970_v22  ;;  %3554 = vmatprep.subr.bf16.mxu0 %v3553_v18 }
 0x5aa   : > { %3556 = vmatpush3.bf16.msra.mxu0 %v3553_v18 }
 0x5ab   : > { %3558 = vmatprep.subr.bf16.mxu0 %v3557_v23 }
 0x5ae   : > { %3560 = vmatpush3.bf16.msra.mxu0 %v3557_v23 }
 0x5af   : > { %3562 = vmatprep.subr.bf16.mxu0 %v3561_v28 }
 0x5b2   : > { %3564 = vmatpush3.bf16.msra.mxu0 %v3561_v28 }
 0x5b3   : > { %3566 = vmatprep.subr.bf16.mxu0 %v3565_v31 }
 0x5b6   : > { %3568 = vmatpush3.bf16.msra.mxu0 %v3565_v31 }
 0x5b7   : > { %3570 = vmatprep.subr.bf16.mxu0 %v3569_v35 }
 0x5ba   : > { %3572 = vmatpush3.bf16.msra.mxu0 %v3569_v35 }
 0x5bb   : > { %3574 = vmatprep.subr.bf16.mxu0 %v3573_v39 }
 0x5be   : > { %3576 = vmatpush3.bf16.msra.mxu0 %v3573_v39 }
 0x5c1   : > { %3323 = vmatmul.mubr.f32.vlgmr.msra.gmra.mrb[10].mxu0 %v971_v43 }
 0x5c2   : > { %3399 = vmatprep.mubr.msk.f32.mxu0 %vm343_vm0, %v4363_v1 }
 0x674   : > { %v3289_v44 = vpop.f32.mrb[8].mxu0 }
 0x675   : > { %v1052_v46 = vadd.f32 1.0, %v3289_v44  ;;  %v1042_v49 = vpop.f32.mrb[9].mxu0 }
 0x676   : > { %v1051_v50 = vadd.f32 1.0, %v1042_v49 }
 0x677   : > { %3791 = vrsqrt.f32 %v1052_v46 }
 0x678   : > { %3793 = vrsqrt.f32 %v1051_v50 }
 0x681   : > { %v3792_v51 = vpop.eup %3791 }
 0x682   : > { %v3794_v34 = vpop.eup %3793  ;;  %1154 = vperm.xlu1 %3780, %v3792_v51   ;;  %v1237_v52 = vmul.f32 %v3792_v51, %v3792_v51 }
 0x683   : > { %1149 = vperm.xlu0 %3779, %v3794_v34   ;;  %v1236_v53 = vmul.f32 %v3794_v34, %v3794_v34  ;;  %v1291_v34 = vrot.slane %v973_v3, %v4390_v24 }
 0x686   : > { %1245 = vperm.xlu1 %3780, %v1237_v52  }
 0x687   : > { %1240 = vperm.xlu0 %3779, %v1236_v53   ;;  %v1297_v53 = vrot.slane %v973_v3, %v4393_v25  ;;  %v975_v3 = vld [vmem:[#allocation10 + $0x8] sm:$0xff] }
 0x694   : > { %v3324_v56 = vpop.f32.mrb[10].mxu0 }
 0x695   : > { %v1138_v57 = vpop.f32.mrb[11].mxu0 }
 0x701   : > { %v1155_v45 = vpop.permute.xlu1 %1154 }
 0x702   : > { %v1158_v59 = vmul.f32 %v3324_v56, %v1155_v45  ;;  %v1150_v60 = vpop.permute.xlu0 %1149 }
 0x703   : > { %v1157_v61 = vmul.f32 %v1150_v60, %v1138_v57 }
 0x705   : > { %v3577_v62 = vpack.c.bf16 %v1158_v59, %v1157_v61  ;;  %v1246_v63 = vpop.permute.xlu1 %1245 }
 0x706   : > { %v1241_v4 = vpop.permute.xlu0 %1240  ;;  %v1249_v6 = vmul.f32 %v3324_v56, %v1246_v63 }
 0x707   : > { %3578 = vmatprep.subr.bf16.mxu1 %v3577_v62  ;;  %v1248_v10 = vmul.f32 %v1241_v4, %v1138_v57 }
 0x708   : > { %3580 = vmatpush3.bf16.msra.mxu1 %v3577_v62 }
 0x70b   : > { %3330 = vmatmul.mubr.msk.f32.vlgmr.msra.gmra.mrb[4].mxu1 %vm343_vm0, %v4366_v2 }
 0x70c   : > { %3336 = vmatprep.mubr.msk.f32.mxu1 %vm343_vm0, %v4363_v1 }
 0x7de   : > { %v3331_v5 = vpop.f32.mrb[4].mxu1 }
 0x7df   : > { %v1235_v7 = vmul.f32 %v3331_v5, %v1155_v45  ;;  %v1225_v9 = vpop.f32.mrb[5].mxu1  ;;  %v1380_v5 = vrot.slane %v975_v3, %v4386_v48 }
 0x7e0   : > { %v1234_v11 = vmul.f32 %v1225_v9, %v1150_v60 }
 0x7e1   : > { %v1251_v12 = vadd.f32 %v1249_v6, %v1235_v7  ;;  %v1386_v6 = vrot.slane %v975_v3, %v4390_v24 }
 0x7e2   : > { %v1250_v13 = vadd.f32 %v1248_v10, %v1234_v11 }
 0x7e3   : > { %v1257_v14 = vadd.f32 %v1255_v8, %v1251_v12 }
 0x7e4   : > { %v1256_v15 = vadd.f32 %v1255_v8, %v1250_v13 }
 0x7e5   : > { %v1259_v16 = vmax.f32 %v1257_v14, 0.0 }
 0x7e6   : > { %v1258_v17 = vmax.f32 %v1256_v15, 0.0 }
 0x7e7   : > { %v1261_v18 = vmul.f32 %v4451_v42, %v1259_v16 }
 0x7e8   : > { %v1260_v20 = vmul.f32 %v4445_v19, %v1258_v17 }
 0x7ea   : > { %v1262_v21 = vadd.f32 %v1261_v18, %v1260_v20 }
 0x7ec   : > { %v1263_v22 = vrot.slane %v1262_v21, 4 }
 0x7ee   : > { %v1264_v23 = vadd.f32 %v1263_v22, %v1262_v21 }
 0x7f0   : > { %v1265_v26 = vrot.slane %v1264_v23, 2 }
 0x7f2   : > { %v1266_v27 = vadd.f32 %v1265_v26, %v1264_v23  ;;  %v1578_v23 = vrot.slane %v975_v3, %v4393_v25  ;;  %v1693_v3 = vld [vmem:[#allocation7 + $0x160] sm:$0xff] }
 0x7f4   : > { %v1267_v28 = vrot.slane %v1266_v27, 1 }
 0x7f6   : > { %v1268_v29 = vadd.f32 %v1267_v28, %v1266_v27 }
 0x7f8   : > { %v1269_v30 = vmul.f32 0.125, %v1268_v29 }
 0x7fa   : > { %v1270_v31 = vsub.f32 %v1258_v17, %v1269_v30  ;;  %v1271_v32 = vsub.f32 %v1259_v16, %v1269_v30 }
 0x7fc   : > { %v1272_v33 = vmul.f32 %v4445_v19, %v1270_v31  ;;  %v1273_v35 = vmul.f32 %v4451_v42, %v1271_v32 }
 0x7fe   : > { %v1274_v37 = vmul.f32 %v1272_v33, %v1272_v33  ;;  %v1275_v38 = vmul.f32 %v1273_v35, %v1273_v35 }
 0x800   : > { %v1276_v39 = vadd.f32 %v1275_v38, %v1274_v37  ;;  %v1681_v37 = vld [vmem:[#allocation7 + $0x100] sm:$0xff]  ;;  %v1682_v38 = vld [vmem:[#allocation7 + $0x108] sm:$0xff] }
 0x802   : > { %v1277_v40 = vrot.slane %v1276_v39, 4 }
 0x804   : > { %v1278_v41 = vadd.f32 %v1277_v40, %v1276_v39 }
 0x806   : > { %v1279_v43 = vrot.slane %v1278_v41, 2 }
 0x808   : > { %v1280_v44 = vadd.f32 %v1279_v43, %v1278_v41  ;;  %v3595_v41 = vpack.c.bf16 %v1682_v38, %v1681_v37  ;;  %v1683_v43 = vld [vmem:[#allocation7 + $0x110] sm:$0xff] }
 0x80a   : > { %v1281_v46 = vrot.slane %v1280_v44, 1 }
 0x80c   : > { %v1282_v49 = vadd.f32 %v1281_v46, %v1280_v44  ;;  %v1684_v44 = vld [vmem:[#allocation7 + $0x118] sm:$0xff]  ;;  %v1685_v46 = vld [vmem:[#allocation7 + $0x120] sm:$0xff] }
 0x80e   : > { %v1283_v50 = vmul.f32 0.125, %v1282_v49  ;;  %v1686_v49 = vld [vmem:[#allocation7 + $0x128] sm:$0xff] }
 0x810   : > { %v1284_v51 = vadd.f32 1e-05, %v1283_v50 }
 0x812   : > { %3795 = vrsqrt.f32 %v1284_v51 }
 0x81c   : > { %v3796_v52 = vpop.eup %3795 }
 0x81d   : > { %v1286_v56 = vmul.f32 %v3796_v52, %v1270_v31  ;;  %v1287_v57 = vmul.f32 %v3796_v52, %v1271_v32 }
 0x81f   : > { %v1292_v45 = vmul.f32 %v1291_v34, %v1286_v56  ;;  %v1293_v59 = vmul.f32 %v1291_v34, %v1287_v57  ;;  %v3603_v34 = vpack.c.bf16 %v1686_v49, %v1685_v46  ;;  %v1688_v56 = vld [vmem:[#allocation7 + $0x138] sm:$0xff] }
 0x821   : > { %v4467_v60 = vadd.f32 %v1297_v53, %v1292_v45  ;;  %v4469_v61 = vadd.f32 %v1297_v53, %v1293_v59  ;;  %v1687_v53 = vld [vmem:[#allocation7 + $0x130] sm:$0xff]  ;;  %v1689_v45 = vld [vmem:[#allocation7 + $0x140] sm:$0xff]  ;;  %v1690_v59 = vld [vmem:[#allocation7 + $0x148] sm:$0xff] }
 0x822   : > { %v3607_v57 = vpack.c.bf16 %v1688_v56, %v1687_v53 }
 0x823   : > { %v1300_v62 = vmul.f32 %v4445_v19, %v4467_v60  ;;  %v1301_v63 = vmul.f32 %v4451_v42, %v4469_v61  ;;  %v1388_v9 = vmul.f32 %v1386_v6, %v4469_v61  ;;  %v1387_v12 = vmul.f32 %v1386_v6, %v4467_v60 }
 0x824   : > { %v3599_v42 = vpack.c.bf16 %v1684_v44, %v1683_v43 }
 0x825   : > { %v3581_v4 = vpack.c.bf16 %v1301_v63, %v1300_v62  ;;  %v3611_v62 = vpack.c.bf16 %v1690_v59, %v1689_v45  ;;  %v1692_v63 = vld [vmem:[#allocation7 + $0x158] sm:$0xff] }
 0x827   : > { %3582 = vmatprep.subr.bf16.mxu1 %v3581_v4 }
 0x828   : > { %3584 = vmatpush3.bf16.msra.mxu1 %v3581_v4 }
 0x82b   : > { %3337 = vmatmul.mubr.msk.f32.vlgmr.msra.gmra.mrb[6].mxu1 %vm343_vm0, %v4366_v2 }
 0x82c   : > { %3343 = vmatprep.mubr.f32.mxu1 %v4056_v36 }
 0x8fe   : > { %v3338_v7 = vpop.f32.mrb[6].mxu1 }
 0x8ff   : > { %v1382_v8 = vmul.f32 %v3338_v7, %v1380_v5  ;;  %v1368_v10 = vpop.f32.mrb[7].mxu1  ;;  %v1695_v7 = vld [vmem:[#allocation7 + $0x170] sm:$0xff] }
 0x900   : > { %v1381_v11 = vmul.f32 %v1380_v5, %v1368_v10  ;;  %v1694_v5 = vld [vmem:[#allocation7 + $0x168] sm:$0xff] }
 0x901   : > { %v1390_v13 = vadd.f32 %v1388_v9, %v1382_v8  ;;  %v3619_v6 = vpack.c.bf16 %v1694_v5, %v1693_v3  ;;  %v1696_v8 = vld [vmem:[#allocation7 + $0x178] sm:$0xff] }
 0x902   : > { %v1389_v14 = vadd.f32 %v1387_v12, %v1381_v11  ;;  %v3623_v9 = vpack.c.bf16 %v1696_v8, %v1695_v7 }
 0x903   : > { %v1394_v15 = vsel %vm1392_vm14, %v1390_v13, -7.8125e+27 }
 0x904   : > { %v1393_v16 = vsel %vm1391_vm15, %v1389_v14, -7.8125e+27 }
 0x905   : > { %v3585_v17 = vpack.c.bf16 %v1394_v15, %v1393_v16 }
 0x907   : > { %3586 = vmatprep.subr.bf16.mxu1 %v3585_v17 }
 0x908   : > { %3588 = vmatpush3.bf16.xpose.msra.mxu1 %v3585_v17 }
 0x909   : > { %3589 = vmatprep.subr.bf16.mxu1 %v4054_v0 }
 0x90f   : > { %3344 = vmatmul.mubr.f32.vlgmr.msra.gmra.mrb[8].mxu1 %v4056_v36 }
 0x910   : > { %3590 = vmatpush3.bf16.xpose.msra.mxu1 %v4054_v0  ;;  %3350 = vmatprep.mubr.f32.mxu1 %v1393_v16 }
 0x917   : > { %3351 = vmatmul.mubr.f32.vlgmr.msra.gmra.mrb[10].mxu1 %v1394_v15 }
 0x918   : > { %3357 = vmatprep.mubr.msk.f32.mxu1 %vm343_vm0, %v4363_v1 }
 0x9e2   : > { %v3345_v18 = vpop.f32.mrb[8].mxu1 }
 0x9e3   : > { %v1461_v20 = vpop.f32.mrb[9].mxu1 }
 0x9ea   : > { %v3352_v21 = vpop.f32.mrb[10].mxu1 }
 0x9eb   : > { %vm1548_vm2 = vcmp.eq.f32.partialorder %v3345_v18, %v3352_v21  ;;  %v1536_v22 = vpop.f32.mrb[11].mxu1  ;;  %vm1546_vm3 = vcmp.gt.f32.partialorder %v3345_v18, %v3352_v21  ;;  %v1580_v30 = vadd.f32 %v3352_v21, %v1578_v23 }
 0x9ec   : > { %vm1547_vm5 = vcmp.eq.f32.partialorder %v1461_v20, %v1536_v22  ;;  %vm1550_vm6 = vmand %vm1548_vm2, %vm923_vm1  ;;  %vm1545_vm7 = vcmp.gt.f32.partialorder %v1461_v20, %v1536_v22  ;;  %v1579_v31 = vadd.f32 %v1578_v23, %v1536_v22 }
 0x9ed   : > { %vm1552_vm8 = vmor %vm1546_vm3, %vm1550_vm6  ;;  %3797 = vtanh.f32 %v1580_v30 }
 0x9ee   : > { %v3028_v26 = vsel %vm1552_vm8, 1.0, %v4057_v58  ;;  %vm1549_vm9 = vmand %vm1547_vm5, %vm922_vm4  ;;  %3799 = vtanh.f32 %v1579_v31 }
 0x9ef   : > { %v1560_v27 = vsel %vm343_vm0, %v3028_v26, 0.0  ;;  %vm1551_vm10 = vmor %vm1545_vm7, %vm1549_vm9 }
 0x9f0   : > { %1561 = vadd.xlane.f32.xlu1 %v1560_v27  ;;  %v3027_v28 = vsel %vm1551_vm10, 1.0, %v4057_v58 }
 0x9f1   : > { %v1557_v29 = vsel %vm343_vm0, %v3027_v28, 0.0 }
 0x9f2   : > { %1558 = vadd.xlane.f32.xlu0 %v1557_v29 }
 0x9f7   : > { %v3798_v32 = vpop.eup %3797 }
 0x9f8   : > { %v3800_v33 = vpop.eup %3799 }
 0xa01   : > { %1590 = vperm.xlu1 %3780, %v3798_v32   ;;  %v1598_v32 = vld [vmem:[#allocation8 + $0x10] sm:$0xff] }
 0xa02   : > { %v1880_v39 = vrot.slane %v1598_v32, %v4386_v48 }
 0xa08   : > { %1585 = vperm.xlu0 %3779, %v3800_v33  }
 0xa7d   : > { %v1562_v35 = vpop.xlane.xlu1 %1561 }
 0xa7e   : > { %vm1564_vm11 = vcmp.lt.f32.partialorder %v1562_v35, 4.0 }
 0xa7f   : > { %vm4506_vm12 = vmand %vm1564_vm11, %vm1392_vm14  ;;  %v1559_v40 = vpop.xlane.xlu0 %1558 }
 0xa80   : > { %vm1563_vm13 = vcmp.lt.f32.partialorder %v1559_v40, 4.0  ;;  %v4527_v12 = vsel %vm4506_vm12, 1.0, %v4057_v58 }
 0xa81   : > { %vm1569_vm2 = vmand %vm1563_vm13, %vm1391_vm15  ;;  %v1591_v10 = vpop.permute.xlu1 %1590  ;;  %vm2017_vm14 = vcmp.gt.f32.partialorder %v4527_v12, 0.0 }
 0xa82   : > { %vm3591_vm3 = vmpackc.low %vm4506_vm12, %vm1569_vm2  ;;  %v4520_v51 = vsel %vm1569_vm2, 1.0, %v4057_v58  ;;  %v1594_v11 = vmul.f32 %v1591_v10, %v4469_v61 }
 0xa83   : > { %3592 = vmatprep.subr.msk.bf16.mxu1 %vm3591_vm3, %v4054_v0  ;;  %vm2016_vm15 = vcmp.gt.f32.partialorder %v4520_v51, 0.0 }
 0xa84   : > { %3594 = vmatpush3.bf16.msk.msra.mxu1 %vm3591_vm3, %v4054_v0  ;;  %v1596_v13 = vmul.f32 %v4527_v12, %v1594_v11 }
 0xa85   : > { %3596 = vmatprep.subr.bf16.mxu1 %v3595_v41 }
 0xa87   : > { %3358 = vmatmul.mubr.msk.f32.vlgmr.msra.gmra.mrb[12].mxu1 %vm343_vm0, %v4366_v2  ;;  %v1586_v50 = vpop.permute.xlu0 %1585 }
 0xa88   : > { %v1593_v19 = vmul.f32 %v1586_v50, %v4467_v60  ;;  %3598 = vmatpush3.bf16.msra.mxu1 %v3595_v41  ;;  %v1691_v60 = vld [vmem:[#allocation7 + $0x150] sm:$0xff] }
 0xa89   : > { %3600 = vmatprep.subr.bf16.mxu1 %v3599_v42  ;;  %v3615_v4 = vpack.c.bf16 %v1692_v63, %v1691_v60 }
 0xa8a   : > { %v1595_v52 = vmul.f32 %v4520_v51, %v1593_v19 }
 0xa8c   : > { %3602 = vmatpush3.bf16.msra.mxu1 %v3599_v42  ;;  %3392 = vmatprep.mubr.f32.mxu1 %v1595_v52 }
 0xa8d   : > { %3604 = vmatprep.subr.bf16.mxu1 %v3603_v34 }
 0xa90   : > { %3606 = vmatpush3.bf16.msra.mxu1 %v3603_v34 }
 0xa91   : > { %3608 = vmatprep.subr.bf16.mxu1 %v3607_v57 }
 0xa94   : > { %3610 = vmatpush3.bf16.msra.mxu1 %v3607_v57 }
 0xa95   : > { %3612 = vmatprep.subr.bf16.mxu1 %v3611_v62 }
 0xa98   : > { %3614 = vmatpush3.bf16.msra.mxu1 %v3611_v62 }
 0xa99   : > { %3616 = vmatprep.subr.bf16.mxu1 %v3615_v4 }
 0xa9c   : > { %3618 = vmatpush3.bf16.msra.mxu1 %v3615_v4 }
 0xa9d   : > { %3620 = vmatprep.subr.bf16.mxu1 %v3619_v6 }
 0xaa0   : > { %3622 = vmatpush3.bf16.msra.mxu1 %v3619_v6 }
 0xaa1   : > { %3624 = vmatprep.subr.bf16.mxu1 %v3623_v9 }
 0xaa4   : > { %3626 = vmatpush3.bf16.msra.mxu1 %v3623_v9 }
 0xaa7   : > { %3393 = vmatmul.mubr.f32.vlgmr.msra.gmra.mrb[14].mxu1 %v1596_v13 }
 0xaa8   : > { %3469 = vmatprep.mubr.msk.f32.mxu1 %vm343_vm0, %v4363_v1 }
 0xb5a   : > { %v3359_v14 = vpop.f32.mrb[12].mxu1 }
 0xb5b   : > { %v1677_v15 = vadd.f32 1.0, %v3359_v14  ;;  %v1667_v16 = vpop.f32.mrb[13].mxu1 }
 0xb5c   : > { %v1676_v17 = vadd.f32 1.0, %v1667_v16 }
 0xb5d   : > { %3801 = vrsqrt.f32 %v1677_v15 }
 0xb5e   : > { %3803 = vrsqrt.f32 %v1676_v17  ;;  %v1916_v17 = vrot.slane %v1598_v32, %v4390_v24 }
 0xb67   : > { %v3802_v61 = vpop.eup %3801 }
 0xb68   : > { %v3804_v18 = vpop.eup %3803  ;;  %1779 = vperm.xlu1 %3780, %v3802_v61   ;;  %v1862_v20 = vmul.f32 %v3802_v61, %v3802_v61 }
 0xb69   : > { %1774 = vperm.xlu0 %3779, %v3804_v18   ;;  %v1861_v21 = vmul.f32 %v3804_v18, %v3804_v18  ;;  %v1922_v18 = vrot.slane %v1598_v32, %v4393_v25  ;;  %v1600_v32 = vld [vmem:[#allocation10 + $0x10] sm:$0xff] }
 0xb6c   : > { %1870 = vperm.xlu1 %3780, %v1862_v20  }
 0xb6d   : > { %1865 = vperm.xlu0 %3779, %v1861_v21  }
 0xb7a   : > { %v3394_v22 = vpop.f32.mrb[14].mxu1 }
 0xb7b   : > { %v1763_v23 = vpop.f32.mrb[15].mxu1 }
 0xbe7   : > { %v1780_v26 = vpop.permute.xlu1 %1779 }
 0xbe8   : > { %v1783_v27 = vmul.f32 %v3394_v22, %v1780_v26  ;;  %v1775_v28 = vpop.permute.xlu0 %1774 }
 0xbe9   : > { %v1782_v29 = vmul.f32 %v1775_v28, %v1763_v23 }
 0xbeb   : > { %v3627_v30 = vpack.c.bf16 %v1783_v27, %v1782_v29  ;;  %v1871_v31 = vpop.permute.xlu1 %1870 }
 0xbec   : > { %v1866_v33 = vpop.permute.xlu0 %1865  ;;  %v1874_v37 = vmul.f32 %v3394_v22, %v1871_v31  ;;  %v4552_v31 = vld [vmem:[%s4339_s12 + $0x8] sm:$0xff] }
 0xbed   : > { %3628 = vmatprep.subr.bf16.mxu0 %v3627_v30  ;;  %v1873_v41 = vmul.f32 %v1866_v33, %v1763_v23  ;;  %v2005_v33 = vrot.slane %v1600_v32, %v4386_v48 }
 0xbee   : > { %3630 = vmatpush3.bf16.msra.mxu0 %v3627_v30 }
 0xbf1   : > { %3400 = vmatmul.mubr.msk.f32.vlgmr.msra.gmra.mrb[12].mxu0 %vm343_vm0, %v4366_v2 }
 0xbf2   : > { %3406 = vmatprep.mubr.msk.f32.mxu0 %vm343_vm0, %v4363_v1 }
 0xcc4   : > { %v3401_v35 = vpop.f32.mrb[12].mxu0 }
 0xcc5   : > { %v1860_v38 = vmul.f32 %v3401_v35, %v1780_v26  ;;  %v1850_v40 = vpop.f32.mrb[13].mxu0  ;;  %v2011_v35 = vrot.slane %v1600_v32, %v4390_v24 }
 0xcc6   : > { %v1859_v43 = vmul.f32 %v1850_v40, %v1775_v28 }
 0xcc7   : > { %v1876_v44 = vadd.f32 %v1874_v37, %v1860_v38 }
 0xcc8   : > { %v1875_v42 = vadd.f32 %v1873_v41, %v1859_v43 }
 0xcc9   : > { %v1882_v46 = vadd.f32 %v1880_v39, %v1876_v44 }
 0xcca   : > { %v1881_v49 = vadd.f32 %v1880_v39, %v1875_v42 }
 0xccb   : > { %v1884_v50 = vmax.f32 %v1882_v46, 0.0 }
 0xccc   : > { %v1883_v2 = vmax.f32 %v1881_v49, 0.0 }
 0xccd   : > { %v1886_v19 = vmul.f32 %v4527_v12, %v1884_v50 }
 0xcce   : > { %v1885_v1 = vmul.f32 %v4520_v51, %v1883_v2 }
 0xcd0   : > { %v1887_v34 = vadd.f32 %v1886_v19, %v1885_v1 }
 0xcd2   : > { %v1888_v52 = vrot.slane %v1887_v34, 4 }
 0xcd4   : > { %v1889_v53 = vadd.f32 %v1888_v52, %v1887_v34 }
 0xcd6   : > { %v1890_v56 = vrot.slane %v1889_v53, 2 }
 0xcd8   : > { %v1891_v57 = vadd.f32 %v1890_v56, %v1889_v53  ;;  %v2203_v53 = vrot.slane %v1600_v32, %v4393_v25  ;;  %v2318_v32 = vld [vmem:[#allocation7 + $0x1e0] sm:$0xff] }
 0xcda   : > { %v1892_v45 = vrot.slane %v1891_v57, 1 }
 0xcdc   : > { %v1893_v59 = vadd.f32 %v1892_v45, %v1891_v57 }
 0xcde   : > { %v1894_v62 = vmul.f32 0.25, %v1893_v59 }
 0xce0   : > { %v1895_v60 = vsub.f32 %v1883_v2, %v1894_v62  ;;  %v1896_v63 = vsub.f32 %v1884_v50, %v1894_v62  ;;  %v4571_v2 = vld [vmem:[%s4339_s12] sm:$0xff] }
 0xce2   : > { %v1897_v4 = vmul.f32 %v4520_v51, %v1895_v60  ;;  %v1898_v3 = vmul.f32 %v4527_v12, %v1896_v63 }
 0xce4   : > { %v1899_v5 = vmul.f32 %v1897_v4, %v1897_v4  ;;  %v1900_v6 = vmul.f32 %v1898_v3, %v1898_v3 }
 0xce6   : > { %v1901_v7 = vadd.f32 %v1900_v6, %v1899_v5  ;;  %v2306_v5 = vld [vmem:[#allocation7 + $0x180] sm:$0xff]  ;;  %v2307_v6 = vld [vmem:[#allocation7 + $0x188] sm:$0xff] }
 0xce8   : > { %v1902_v8 = vrot.slane %v1901_v7, 4 }
 0xcea   : > { %v1903_v9 = vadd.f32 %v1902_v8, %v1901_v7 }
 0xcec   : > { %v1904_v10 = vrot.slane %v1903_v9, 2 }
 0xcee   : > { %v1905_v11 = vadd.f32 %v1904_v10, %v1903_v9  ;;  %v3645_v9 = vpack.c.bf16 %v2307_v6, %v2306_v5  ;;  %v2308_v10 = vld [vmem:[#allocation7 + $0x190] sm:$0xff] }
 0xcf0   : > { %v1906_v13 = vrot.slane %v1905_v11, 1 }
 0xcf2   : > { %v1907_v14 = vadd.f32 %v1906_v13, %v1905_v11  ;;  %v2309_v11 = vld [vmem:[#allocation7 + $0x198] sm:$0xff]  ;;  %v2310_v13 = vld [vmem:[#allocation7 + $0x1a0] sm:$0xff] }
 0xcf4   : > { %v1908_v15 = vmul.f32 0.25, %v1907_v14  ;;  %v2311_v14 = vld [vmem:[#allocation7 + $0x1a8] sm:$0xff] }
 0xcf6   : > { %v1909_v16 = vadd.f32 1e-05, %v1908_v15 }
 0xcf8   : > { %3805 = vrsqrt.f32 %v1909_v16 }
 0xd02   : > { %v3806_v61 = vpop.eup %3805 }
 0xd03   : > { %v1911_v20 = vmul.f32 %v3806_v61, %v1895_v60  ;;  %v1912_v21 = vmul.f32 %v3806_v61, %v1896_v63 }
 0xd05   : > { %v1917_v22 = vmul.f32 %v1916_v17, %v1911_v20  ;;  %v1918_v23 = vmul.f32 %v1916_v17, %v1912_v21  ;;  %v3653_v17 = vpack.c.bf16 %v2311_v14, %v2310_v13  ;;  %v2313_v20 = vld [vmem:[#allocation7 + $0x1b8] sm:$0xff] }
 0xd07   : > { %v4543_v26 = vadd.f32 %v1922_v18, %v1917_v22  ;;  %v4545_v27 = vadd.f32 %v1922_v18, %v1918_v23  ;;  %v2312_v18 = vld [vmem:[#allocation7 + $0x1b0] sm:$0xff]  ;;  %v2314_v22 = vld [vmem:[#allocation7 + $0x1c0] sm:$0xff]  ;;  %v2315_v23 = vld [vmem:[#allocation7 + $0x1c8] sm:$0xff] }
 0xd08   : > { %v3657_v21 = vpack.c.bf16 %v2313_v20, %v2312_v18 }
 0xd09   : > { %v1925_v28 = vmul.f32 %v4520_v51, %v4543_v26  ;;  %v1926_v29 = vmul.f32 %v4527_v12, %v4545_v27  ;;  %v2013_v39 = vmul.f32 %v2011_v35, %v4545_v27  ;;  %v2012_v43 = vmul.f32 %v2011_v35, %v4543_v26 }
 0xd0a   : > { %v3649_v12 = vpack.c.bf16 %v2309_v11, %v2308_v10 }
 0xd0b   : > { %v3631_v30 = vpack.c.bf16 %v1926_v29, %v1925_v28  ;;  %v3661_v28 = vpack.c.bf16 %v2315_v23, %v2314_v22  ;;  %v2317_v29 = vld [vmem:[#allocation7 + $0x1d8] sm:$0xff] }
 0xd0d   : > { %3632 = vmatprep.subr.bf16.mxu0 %v3631_v30 }
 0xd0e   : > { %3634 = vmatpush3.bf16.msra.mxu0 %v3631_v30 }
 0xd11   : > { %3407 = vmatmul.mubr.msk.f32.vlgmr.msra.gmra.mrb[14].mxu0 %vm343_vm0, %v4552_v31 }
 0xd12   : > { %3413 = vmatprep.mubr.f32.mxu0 %v4056_v36 }
 0xde4   : > { %v3408_v37 = vpop.f32.mrb[14].mxu0 }
 0xde5   : > { %v2007_v38 = vmul.f32 %v3408_v37, %v2005_v33  ;;  %v1993_v40 = vpop.f32.mrb[15].mxu0  ;;  %v2320_v37 = vld [vmem:[#allocation7 + $0x1f0] sm:$0xff] }
 0xde6   : > { %v2006_v41 = vmul.f32 %v2005_v33, %v1993_v40  ;;  %v2319_v33 = vld [vmem:[#allocation7 + $0x1e8] sm:$0xff] }
 0xde7   : > { %v2015_v44 = vadd.f32 %v2013_v39, %v2007_v38  ;;  %v3669_v35 = vpack.c.bf16 %v2319_v33, %v2318_v32  ;;  %v2321_v38 = vld [vmem:[#allocation7 + $0x1f8] sm:$0xff] }
 0xde8   : > { %v2014_v42 = vadd.f32 %v2012_v43, %v2006_v41  ;;  %v3673_v39 = vpack.c.bf16 %v2321_v38, %v2320_v37 }
 0xde9   : > { %v2019_v46 = vsel %vm2017_vm14, %v2015_v44, -7.8125e+27 }
 0xdea   : > { %v2018_v49 = vsel %vm2016_vm15, %v2014_v42, -7.8125e+27 }
 0xdeb   : > { %v3635_v50 = vpack.c.bf16 %v2019_v46, %v2018_v49 }
 0xded   : > { %3636 = vmatprep.subr.bf16.mxu0 %v3635_v50 }
 0xdee   : > { %3638 = vmatpush3.bf16.xpose.msra.mxu0 %v3635_v50 }
 0xdef   : > { %3639 = vmatprep.subr.bf16.mxu0 %v4054_v0 }
 0xdf5   : > { %3414 = vmatmul.mubr.f32.vlgmr.msra.gmra.mrb[16].mxu0 %v4056_v36 }
 0xdf6   : > { %3640 = vmatpush3.bf16.xpose.msra.mxu0 %v4054_v0  ;;  %3420 = vmatprep.mubr.f32.mxu0 %v2018_v49 }
 0xdfd   : > { %3421 = vmatmul.mubr.f32.vlgmr.msra.gmra.mrb[18].mxu0 %v2019_v46 }
 0xdfe   : > { %3427 = vmatprep.mubr.msk.f32.mxu0 %vm343_vm0, %v4571_v2 }
 0xec8   : > { %v3415_v19 = vpop.f32.mrb[16].mxu0 }
 0xec9   : > { %v2086_v1 = vpop.f32.mrb[17].mxu0 }
 0xed0   : > { %v3422_v34 = vpop.f32.mrb[18].mxu0 }
 0xed1   : > { %vm2173_vm5 = vcmp.eq.f32.partialorder %v3415_v19, %v3422_v34  ;;  %v2161_v52 = vpop.f32.mrb[19].mxu0  ;;  %vm2171_vm6 = vcmp.gt.f32.partialorder %v3415_v19, %v3422_v34  ;;  %v2205_v62 = vadd.f32 %v3422_v34, %v2203_v53 }
 0xed2   : > { %vm2172_vm7 = vcmp.eq.f32.partialorder %v2086_v1, %v2161_v52  ;;  %vm2175_vm8 = vmand %vm2173_vm5, %vm923_vm1  ;;  %vm2170_vm9 = vcmp.gt.f32.partialorder %v2086_v1, %v2161_v52  ;;  %v2204_v60 = vadd.f32 %v2203_v53, %v2161_v52 }
 0xed3   : > { %vm2177_vm10 = vmor %vm2171_vm6, %vm2175_vm8  ;;  %3807 = vtanh.f32 %v2205_v62 }
 0xed4   : > { %v3040_v56 = vsel %vm2177_vm10, 1.0, %v4057_v58  ;;  %vm2174_vm11 = vmand %vm2172_vm7, %vm922_vm4  ;;  %3809 = vtanh.f32 %v2204_v60 }
 0xed5   : > { %v2185_v57 = vsel %vm343_vm0, %v3040_v56, 0.0  ;;  %vm2176_vm12 = vmor %vm2170_vm9, %vm2174_vm11 }
 0xed6   : > { %2186 = vadd.xlane.f32.xlu1 %v2185_v57  ;;  %v3039_v45 = vsel %vm2176_vm12, 1.0, %v4057_v58 }
 0xed7   : > { %v2182_v59 = vsel %vm343_vm0, %v3039_v45, 0.0 }
 0xed8   : > { %2183 = vadd.xlane.f32.xlu0 %v2182_v59 }
 0xedd   : > { %v3808_v63 = vpop.eup %3807 }
 0xede   : > { %v3810_v4 = vpop.eup %3809 }
 0xee7   : > { %2215 = vperm.xlu1 %3780, %v3808_v63   ;;  %v2223_v63 = vld [vmem:[#allocation8 + $0x18] sm:$0xff] }
 0xee8   : > { %v2505_v7 = vrot.slane %v2223_v63, %v4386_v48 }
 0xeee   : > { %2210 = vperm.xlu0 %3779, %v3810_v4  }
 0xf63   : > { %v2187_v3 = vpop.xlane.xlu1 %2186 }
 0xf64   : > { %vm2189_vm13 = vcmp.lt.f32.partialorder %v2187_v3, 2.0 }
 0xf65   : > { %vm4588_vm2 = vmand %vm2189_vm13, %vm2017_vm14  ;;  %v2184_v8 = vpop.xlane.xlu0 %2183 }
 0xf66   : > { %vm2188_vm3 = vcmp.lt.f32.partialorder %v2184_v8, 2.0  ;;  %v4609_v43 = vsel %vm4588_vm2, 1.0, %v4057_v58 }
 0xf67   : > { %vm2194_vm5 = vmand %vm2188_vm3, %vm2016_vm15  ;;  %v2216_v40 = vpop.permute.xlu1 %2215  ;;  %vm2642_vm14 = vcmp.gt.f32.partialorder %v4609_v43, 0.0 }
 0xf68   : > { %vm3641_vm6 = vmpackc.low %vm4588_vm2, %vm2194_vm5  ;;  %v4602_v16 = vsel %vm2194_vm5, 1.0, %v4057_v58  ;;  %v2219_v41 = vmul.f32 %v2216_v40, %v4545_v27 }
 0xf69   : > { %3642 = vmatprep.subr.msk.bf16.mxu0 %vm3641_vm6, %v4054_v0  ;;  %vm2641_vm15 = vcmp.gt.f32.partialorder %v4602_v16, 0.0 }
 0xf6a   : > { %3644 = vmatpush3.bf16.msk.msra.mxu0 %vm3641_vm6, %v4054_v0  ;;  %v2221_v44 = vmul.f32 %v4609_v43, %v2219_v41 }
 0xf6b   : > { %3646 = vmatprep.subr.bf16.mxu0 %v3645_v9 }
 0xf6d   : > { %3428 = vmatmul.mubr.msk.f32.vlgmr.msra.gmra.mrb[20].mxu0 %vm343_vm0, %v4552_v31  ;;  %v2211_v15 = vpop.permute.xlu0 %2210 }
 0xf6e   : > { %v2218_v51 = vmul.f32 %v2211_v15, %v4543_v26  ;;  %3648 = vmatpush3.bf16.msra.mxu0 %v3645_v9  ;;  %v2316_v26 = vld [vmem:[#allocation7 + $0x1d0] sm:$0xff] }
 0xf6f   : > { %3650 = vmatprep.subr.bf16.mxu0 %v3649_v12  ;;  %v3665_v30 = vpack.c.bf16 %v2317_v29, %v2316_v26 }
 0xf70   : > { %v2220_v61 = vmul.f32 %v4602_v16, %v2218_v51 }
 0xf72   : > { %3652 = vmatpush3.bf16.msra.mxu0 %v3649_v12  ;;  %3462 = vmatprep.mubr.f32.mxu0 %v2220_v61 }
 0xf73   : > { %3654 = vmatprep.subr.bf16.mxu0 %v3653_v17 }
 0xf76   : > { %3656 = vmatpush3.bf16.msra.mxu0 %v3653_v17 }
 0xf77   : > { %3658 = vmatprep.subr.bf16.mxu0 %v3657_v21 }
 0xf7a   : > { %3660 = vmatpush3.bf16.msra.mxu0 %v3657_v21 }
 0xf7b   : > { %3662 = vmatprep.subr.bf16.mxu0 %v3661_v28 }
 0xf7e   : > { %3664 = vmatpush3.bf16.msra.mxu0 %v3661_v28 }
 0xf7f   : > { %3666 = vmatprep.subr.bf16.mxu0 %v3665_v30 }
 0xf82   : > { %3668 = vmatpush3.bf16.msra.mxu0 %v3665_v30 }
 0xf83   : > { %3670 = vmatprep.subr.bf16.mxu0 %v3669_v35 }
 0xf86   : > { %3672 = vmatpush3.bf16.msra.mxu0 %v3669_v35 }
 0xf87   : > { %3674 = vmatprep.subr.bf16.mxu0 %v3673_v39 }
 0xf8a   : > { %3676 = vmatpush3.bf16.msra.mxu0 %v3673_v39 }
 0xf8d   : > { %3463 = vmatmul.mubr.f32.vlgmr.msra.gmra.mrb[22].mxu0 %v2221_v44 }
0x1040   : > { %v3429_v42 = vpop.f32.mrb[20].mxu0 }
0x1041   : > { %v2302_v46 = vadd.f32 1.0, %v3429_v42  ;;  %v2292_v49 = vpop.f32.mrb[21].mxu0 }
0x1042   : > { %v2301_v50 = vadd.f32 1.0, %v2292_v49 }
0x1043   : > { %3811 = vrsqrt.f32 %v2302_v46 }
0x1044   : > { %3813 = vrsqrt.f32 %v2301_v50 }
0x104d   : > { %v3812_v19 = vpop.eup %3811 }
0x104e   : > { %v3814_v1 = vpop.eup %3813  ;;  %2404 = vperm.xlu1 %3780, %v3812_v19   ;;  %v2487_v27 = vmul.f32 %v3812_v19, %v3812_v19  ;;  %v2541_v19 = vrot.slane %v2223_v63, %v4390_v24 }
0x104f   : > { %2399 = vperm.xlu0 %3779, %v3814_v1   ;;  %v2486_v34 = vmul.f32 %v3814_v1, %v3814_v1 }
0x1052   : > { %2495 = vperm.xlu1 %3780, %v2487_v27   ;;  %v2547_v27 = vrot.slane %v2223_v63, %v4393_v25  ;;  %v2225_v63 = vld [vmem:[#allocation10 + $0x18] sm:$0xff] }
0x1053   : > { %2490 = vperm.xlu0 %3779, %v2486_v34  }
0x1060   : > { %v3464_v52 = vpop.f32.mrb[22].mxu0 }
0x1061   : > { %v2388_v53 = vpop.f32.mrb[23].mxu0 }
0x10cd   : > { %v2405_v56 = vpop.permute.xlu1 %2404 }
0x10ce   : > { %v2408_v57 = vmul.f32 %v3464_v52, %v2405_v56  ;;  %v2400_v45 = vpop.permute.xlu0 %2399 }
0x10cf   : > { %v2407_v59 = vmul.f32 %v2400_v45, %v2388_v53 }
0x10d1   : > { %v3677_v62 = vpack.c.bf16 %v2408_v57, %v2407_v59  ;;  %v2496_v60 = vpop.permute.xlu1 %2495 }
0x10d2   : > { %v2491_v4 = vpop.permute.xlu0 %2490  ;;  %v2499_v5 = vmul.f32 %v3464_v52, %v2496_v60 }
0x10d3   : > { %3678 = vmatprep.subr.bf16.mxu1 %v3677_v62  ;;  %v2498_v9 = vmul.f32 %v2491_v4, %v2388_v53  ;;  %v2630_v4 = vrot.slane %v2225_v63, %v4386_v48 }
0x10d4   : > { %3680 = vmatpush3.bf16.msra.mxu1 %v3677_v62 }
0x10d7   : > { %3470 = vmatmul.mubr.msk.f32.vlgmr.msra.gmra.mrb[16].mxu1 %vm343_vm0, %v4552_v31 }
0x10d8   : > { %3476 = vmatprep.mubr.msk.f32.mxu1 %vm343_vm0, %v4571_v2 }
0x11aa   : > { %v3471_v3 = vpop.f32.mrb[16].mxu1 }
0x11ab   : > { %v2485_v6 = vmul.f32 %v3471_v3, %v2405_v56  ;;  %v2475_v8 = vpop.f32.mrb[17].mxu1  ;;  %v2636_v3 = vrot.slane %v2225_v63, %v4390_v24 }
0x11ac   : > { %v2484_v10 = vmul.f32 %v2475_v8, %v2400_v45 }
0x11ad   : > { %v2501_v11 = vadd.f32 %v2499_v5, %v2485_v6 }
0x11ae   : > { %v2500_v12 = vadd.f32 %v2498_v9, %v2484_v10 }
0x11af   : > { %v2507_v13 = vadd.f32 %v2505_v7, %v2501_v11 }
0x11b0   : > { %v2506_v14 = vadd.f32 %v2505_v7, %v2500_v12 }
0x11b1   : > { %v2509_v15 = vmax.f32 %v2507_v13, 0.0 }
0x11b2   : > { %v2508_v51 = vmax.f32 %v2506_v14, 0.0 }
0x11b3   : > { %v2511_v17 = vmul.f32 %v4609_v43, %v2509_v15 }
0x11b4   : > { %v2510_v2 = vmul.f32 %v4602_v16, %v2508_v51 }
0x11b6   : > { %v2512_v61 = vadd.f32 %v2511_v17, %v2510_v2 }
0x11b8   : > { %v2513_v18 = vrot.slane %v2512_v61, 4 }
0x11ba   : > { %v2514_v20 = vadd.f32 %v2513_v18, %v2512_v61 }
0x11bc   : > { %v2515_v21 = vrot.slane %v2514_v20, 2 }
0x11be   : > { %v2516_v22 = vadd.f32 %v2515_v21, %v2514_v20 }
0x11c0   : > { %v2517_v23 = vrot.slane %v2516_v22, 1 }
0x11c2   : > { %v2518_v28 = vadd.f32 %v2517_v23, %v2516_v22 }
0x11c4   : > { %v2519_v26 = vmul.f32 0.5, %v2518_v28 }
0x11c6   : > { %v2520_v29 = vsub.f32 %v2508_v51, %v2519_v26  ;;  %v2521_v30 = vsub.f32 %v2509_v15, %v2519_v26 }
0x11c8   : > { %v2522_v32 = vmul.f32 %v4602_v16, %v2520_v29  ;;  %v2523_v33 = vmul.f32 %v4609_v43, %v2521_v30 }
0x11ca   : > { %v2524_v35 = vmul.f32 %v2522_v32, %v2522_v32  ;;  %v2525_v37 = vmul.f32 %v2523_v33, %v2523_v33 }
0x11cc   : > { %v2526_v38 = vadd.f32 %v2525_v37, %v2524_v35 }
0x11ce   : > { %v2527_v39 = vrot.slane %v2526_v38, 4 }
0x11d0   : > { %v2528_v40 = vadd.f32 %v2527_v39, %v2526_v38 }
0x11d2   : > { %v2529_v41 = vrot.slane %v2528_v40, 2 }
0x11d4   : > { %v2530_v44 = vadd.f32 %v2529_v41, %v2528_v40 }
0x11d6   : > { %v2531_v42 = vrot.slane %v2530_v44, 1 }
0x11d8   : > { %v2532_v46 = vadd.f32 %v2531_v42, %v2530_v44 }
0x11da   : > { %v2533_v49 = vmul.f32 0.5, %v2532_v46 }
0x11dc   : > { %v2534_v50 = vadd.f32 1e-05, %v2533_v49 }
0x11de   : > { %3815 = vrsqrt.f32 %v2534_v50 }
0x11e8   : > { %v3816_v1 = vpop.eup %3815 }
0x11e9   : > { %v2536_v34 = vmul.f32 %v3816_v1, %v2520_v29  ;;  %v2537_v52 = vmul.f32 %v3816_v1, %v2521_v30 }
0x11eb   : > { %v2542_v53 = vmul.f32 %v2541_v19, %v2536_v34  ;;  %v2543_v56 = vmul.f32 %v2541_v19, %v2537_v52 }
0x11ed   : > { %v4623_v57 = vadd.f32 %v2547_v27, %v2542_v53  ;;  %v4625_v45 = vadd.f32 %v2547_v27, %v2543_v56 }
0x11ef   : > { %v2550_v59 = vmul.f32 %v4602_v16, %v4623_v57  ;;  %v2551_v62 = vmul.f32 %v4609_v43, %v4625_v45  ;;  %v2638_v7 = vmul.f32 %v2636_v3, %v4625_v45  ;;  %v2637_v10 = vmul.f32 %v2636_v3, %v4623_v57 }
0x11f1   : > { %v3681_v60 = vpack.c.bf16 %v2551_v62, %v2550_v59 }
0x11f3   : > { %3682 = vmatprep.subr.bf16.mxu1 %v3681_v60 }
0x11f4   : > { %3684 = vmatpush3.bf16.msra.mxu1 %v3681_v60 }
0x11f7   : > { %3477 = vmatmul.mubr.msk.f32.vlgmr.msra.gmra.mrb[18].mxu1 %vm343_vm0, %v4552_v31 }
0x11f8   : > { %3483 = vmatprep.mubr.f32.mxu1 %v4056_v36 }
0x12ca   : > { %v3478_v5 = vpop.f32.mrb[18].mxu1 }
0x12cb   : > { %v2632_v6 = vmul.f32 %v3478_v5, %v2630_v4  ;;  %v2618_v8 = vpop.f32.mrb[19].mxu1 }
0x12cc   : > { %v2631_v9 = vmul.f32 %v2630_v4, %v2618_v8 }
0x12cd   : > { %v2640_v11 = vadd.f32 %v2638_v7, %v2632_v6 }
0x12ce   : > { %v2639_v12 = vadd.f32 %v2637_v10, %v2631_v9 }
0x12cf   : > { %v2644_v31 = vsel %vm2642_vm14, %v2640_v11, -7.8125e+27 }
0x12d0   : > { %v2643_v48 = vsel %vm2641_vm15, %v2639_v12, -7.8125e+27 }
0x12d1   : > { %v3685_v24 = vpack.c.bf16 %v2644_v31, %v2643_v48 }
0x12d3   : > { %3686 = vmatprep.subr.bf16.mxu1 %v3685_v24 }
0x12d4   : > { %3688 = vmatpush3.bf16.xpose.msra.mxu1 %v3685_v24 }
0x12d5   : > { %3689 = vmatprep.subr.bf16.mxu1 %v4054_v0 }
0x12db   : > { %3484 = vmatmul.mubr.f32.vlgmr.msra.gmra.mrb[20].mxu1 %v4056_v36 }
0x12dc   : > { %3690 = vmatpush3.bf16.xpose.msra.mxu1 %v4054_v0  ;;  %3490 = vmatprep.mubr.f32.mxu1 %v2643_v48  ;;  %v2828_v0 = vrot.slane %v2225_v63, %v4393_v25 }
0x12e3   : > { %3491 = vmatmul.mubr.f32.vlgmr.msra.gmra.mrb[22].mxu1 %v2644_v31 }
0x13ae   : > { %v3485_v13 = vpop.f32.mrb[20].mxu1 }
0x13af   : > { %v2711_v14 = vpop.f32.mrb[21].mxu1 }
0x13b6   : > { %v3492_v15 = vpop.f32.mrb[22].mxu1 }
0x13b7   : > { %vm2798_vm7 = vcmp.eq.f32.partialorder %v3485_v13, %v3492_v15  ;;  %v2786_v51 = vpop.f32.mrb[23].mxu1  ;;  %vm2796_vm8 = vcmp.gt.f32.partialorder %v3485_v13, %v3492_v15  ;;  %v2830_v54 = vadd.f32 %v3492_v15, %v2828_v0 }
0x13b8   : > { %vm2795_vm9 = vcmp.gt.f32.partialorder %v2711_v14, %v2786_v51  ;;  %vm2797_vm10 = vcmp.eq.f32.partialorder %v2711_v14, %v2786_v51  ;;  %vm2800_vm11 = vmand %vm2798_vm7, %vm923_vm1  ;;  %v2829_v18 = vadd.f32 %v2828_v0, %v2786_v51 }
0x13b9   : > { %vm2799_vm12 = vmand %vm2797_vm10, %vm922_vm4  ;;  %3817 = vtanh.f32 %v2830_v54 }
0x13ba   : > { %vm2802_vm13 = vmor %vm2796_vm8, %vm2800_vm11  ;;  %3819 = vtanh.f32 %v2829_v18 }
0x13bb   : > { %v3052_v36 = vsel %vm2802_vm13, 1.0, %v4057_v58  ;;  %vm2801_vm2 = vmor %vm2795_vm9, %vm2799_vm12 }
0x13bc   : > { %v2810_v17 = vsel %vm343_vm0, %v3052_v36, 0.0  ;;  %v3051_v2 = vsel %vm2801_vm2, 1.0, %v4057_v58 }
0x13bd   : > { %2811 = vadd.xlane.f32.xlu1 %v2810_v17  ;;  %v2807_v61 = vsel %vm343_vm0, %v3051_v2, 0.0 }
0x13be   : > { %2808 = vadd.xlane.f32.xlu0 %v2807_v61 }
0x13c3   : > { %v3818_v47 = vpop.eup %3817 }
0x13c4   : > { %v3820_v55 = vpop.eup %3819 }
0x13ce   : > { %2840 = vperm.xlu1 %3780, %v3818_v47  }
0x13d4   : > { %2835 = vperm.xlu0 %3779, %v3820_v55  }
0x144a   : > { %v2812_v25 = vpop.xlane.xlu1 %2811 }
0x144b   : > { %v2809_v20 = vpop.xlane.xlu0 %2808  ;;  %vm2814_vm1 = vcmp.lt.f32.partialorder %v2812_v25, 1.0 }
0x144c   : > { %vm2813_vm4 = vcmp.lt.f32.partialorder %v2809_v20, 1.0  ;;  %vm2820_vm3 = vmand %vm2814_vm1, %vm2642_vm14 }
0x144d   : > { %vm2819_vm0 = vmand %vm2813_vm4, %vm2641_vm15  ;;  %v3054_v26 = vsel %vm2820_vm3, 1.0, %v4057_v58 }
0x144e   : > { %v2841_v21 = vpop.permute.xlu1 %2840  ;;  %v3053_v29 = vsel %vm2819_vm0, 1.0, %v4057_v58 }
0x144f   : > { %v2844_v22 = vmul.f32 %v2841_v21, %v4625_v45 }
0x1451   : > { %v2846_v30 = vmul.f32 %v3054_v26, %v2844_v22 }
0x1453   : > { %v2836_v23 = vpop.permute.xlu0 %2835 }
0x1454   : > { %v2843_v28 = vmul.f32 %v2836_v23, %v4623_v57 }
0x1456   : > { %v2845_v32 = vmul.f32 %v3053_v29, %v2843_v28 }
0x1458   : > { %v2847_v33 = vadd.f32 %v2846_v30, %v2845_v32 }
0x145a   : > { %v2848_v35 = vrot.slane %v2847_v33, 4 }
0x145c   : > { %v2849_v43 = vadd.f32 %v2848_v35, %v2847_v33 }
0x145e   : > { %v2850_v37 = vrot.slane %v2849_v43, 2 }
0x1460   : > { %v2851_v16 = vadd.f32 %v2850_v37, %v2849_v43 }
0x1462   : > { %v2852_v38 = vrot.slane %v2851_v16, 1 }
0x1464   : > { %v2853_v39 = vadd.f32 %v2852_v38, %v2851_v16 }
0x1466   : > { %2854 = vst [vmem:[%s325_s27] sm:$0xff] %v2853_v39 }
0x1467   : > { %3980 = shalt.err (!%p3977_p3)
}
0x1468   : > { %s3981_s16 = scalar_lea.hbm %s4671_s23, 128  ;;  %s3985_s11 = scalar_lea.hbm %s4720_s5, 256 }
0x1469   : > { %p3982_p9 = scmp.ne.s32.totalorder %s4671_s23, %s3981_s16  ;;  %p3986_p7 = scmp.lt.u32.totalorder %s4671_s23, %s4720_s5 }
0x146a   : > { %p3987_p12 = scmp.lt.u32.totalorder %s3985_s11, %s3981_s16  ;;  %p3989_p2 = scmp.lt.u32.totalorder %s3981_s16, %s4671_s23 }
0x146b   : > { %p3983_p13 = pnand %p3982_p9, %p4243_p5 }
0x146c   : > { %p3988_p1 = por %p3987_p12, %p3986_p7 }
0x146d   : > { %p3984_p11 = pneg %p3983_p13 }
0x146e   : > { %p3990_p4 = por %p3989_p2, %p3988_p1 }
0x1470   : > { %p3991_p0 = pnand %p3990_p4, %p3984_p11 }
0x1472   : > { %3994 = shalt.err (!%p3991_p0)
}
0x1473   : > { %3707 = dma.vmem_to_hbm [thread:$0]  (%p4243_p5), %s4673_s29, 128, %s4671_s23, %s2856_s10  }
0x1474 PF: > { %s2881_s6 = sand.u32 1, %s4033_s18   ;;  %p4756_p8 = scmp.ne.s32.totalorder %s4733_s25, 0 }
0x1475   : > { %p4757_p6 = scmp.ge.s32.totalorder %s4045_s21, 2  ;;  %s2882_s26 = scalar_lea.sflag [#allocation4], %s2881_s6 }
0x1477   : > { %p3727_p10 = pnand %p4757_p6, %p4756_p8 }
0x1479   : > { %4028 = dma.done.wait (!%p3727_p10), %s2882_s26, 128  }
0x147a   : > { %4030 = vsyncadd (!%p3727_p10), %s2882_s26, 4294967168  ;;  %p22_p3 = scmp.ge.s32.totalorder %s4229_s14, 4   ;;  %s4758_s18 = smov %s4037_s19 }
0x147b   : > { %s4759_s19 = smov %s4041_s20  ;;  %s4760_s20 = smov %s4239_s30 }
0x147c   : > { %s4761_s21 = smov %s4229_s14  ;;  %24 = sbr.rel (!%p22_p3) target bundleno = 13 (0xd), region = 119 }
0x1483   :  { %2887 = vsyncpa [#allocation3], 1 }
0x1484   :  { %2889 = vsyncpa [#allocation3 + $0x1], 1 }
0x1485   :  { %2890 = vsyncpa [#allocation6], 1 }
0x1486   :  { %2892 = vsyncpa [#allocation6 + $0x1], 1 }
0x1487   :  { %2893 = vsyncpa [#allocation9], 1 }
0x1488   :  { %2894 = vsyncpa [#allocation4], 1 }
0x1489   :  { %2896 = vsyncpa [#allocation4 + $0x1], 1 }

</bundles_post_ra>
